<compile_context>
chip_gen: v7x
topology: tpu7x:2x2x1
jax: 0.10.0
libtpu: 0.0.40
codegen_flags: <defaults>
</compile_context>

<pallas_src>
import functools

import jax
import jax.numpy as jnp
from jax.experimental import pallas as pl
from jax.experimental.pallas import tpu as pltpu

LANE = 128


def _round_up(x, m):
    return ((x + m - 1) // m) * m


def _vmem_capacity_bytes():
    try:
        return int(pltpu.get_tpu_info().vmem_capacity_bytes)
    except Exception:
        return 64 * 1024 * 1024  # conservative: v7x per-TC VMEM


def init_mlp_params(key, input_size, output_size, hidden_size, num_layers,
                    layer_norm=False, dtype=jnp.float32):
    """Deterministic init mimicking nn.Linear U(-1/sqrt(fan_in), 1/sqrt(fan_in)).
    Weights stored (in, out) so the kernel computes h @ W + b directly."""
    layer_cfg = []
    params = []

    def linear(k, fan_in, fan_out):
        kw, kb = jax.random.split(k)
        bound = 1.0 / float(fan_in) ** 0.5
        w = jax.random.uniform(kw, (fan_in, fan_out), dtype, -bound, bound)
        b = jax.random.uniform(kb, (1, fan_out), dtype, -bound, bound)
        return w, b

    keys = jax.random.split(key, num_layers + 1)

    # first Linear (+Tanh). NOTE: module bug drops the first LayerNorm.
    w, b = linear(keys[0], input_size, hidden_size)
    params += [w, b]
    layer_cfg.append({"ln": False, "act": True})

    # hidden Linears (+optional LN before each, +Tanh)
    for i in range(num_layers - 1):
        if layer_norm:
            params += [jnp.ones((1, hidden_size), dtype),
                       jnp.zeros((1, hidden_size), dtype)]
        w, b = linear(keys[1 + i], hidden_size, hidden_size)
        params += [w, b]
        layer_cfg.append({"ln": layer_norm, "act": True})

    # output Linear (no activation)
    w, b = linear(keys[num_layers], hidden_size, output_size)
    params += [w, b]
    layer_cfg.append({"ln": False, "act": False})

    return params, tuple(layer_cfg)


def prepare_params(params, layer_cfg, input_size, hidden_size, output_size,
                   dtype=jnp.float32):
    """Pad feature dims to the 128-lane width and pack every (1, F) parameter
    (biases, LN gamma/beta) into a single stacked (n_small, P) array."""
    in_pad = _round_up(input_size, LANE)
    hid_pad = _round_up(hidden_size, LANE)
    out_pad = _round_up(output_size, LANE)
    P = max(hid_pad, out_pad)

    def pad_row(v):
        v = jnp.asarray(v, dtype).reshape(1, -1)
        return jnp.zeros((1, P), dtype).at[:, :v.shape[1]].set(v)

    weights, small_rows, meta = [], [], []
    idx = 0
    n_layers = len(layer_cfg)
    for li, cfg in enumerate(layer_cfg):
        m = {}
        if cfg["ln"]:
            g, b = params[idx], params[idx + 1]
            idx += 2
            m["ln_g_row"] = len(small_rows); small_rows.append(pad_row(g))
            m["ln_b_row"] = len(small_rows); small_rows.append(pad_row(b))
        w, b = params[idx], params[idx + 1]
        idx += 2
        fin = in_pad if li == 0 else hid_pad
        fout = out_pad if li == n_layers - 1 else hid_pad
        w_p = jnp.zeros((fin, fout), dtype).at[:w.shape[0], :w.shape[1]].set(
            w.astype(dtype))
        weights.append(w_p)
        m["b_row"] = len(small_rows); small_rows.append(pad_row(b))
        meta.append(m)

    small = jnp.concatenate(small_rows, axis=0)  # (n_small, P)

    spec = dict(layer_cfg=tuple(layer_cfg), meta=tuple(meta),
                input_size=input_size, hidden_size=hidden_size,
                output_size=output_size,
                in_pad=in_pad, hid_pad=hid_pad, out_pad=out_pad, P=P)
    return weights, small, spec


def _make_kernel(spec, use_bf16):
    layer_cfg = spec["layer_cfg"]
    meta = spec["meta"]
    hid_pad = spec["hid_pad"]
    inv_h = 1.0 / float(spec["hidden_size"])

    def kernel(x_ref, small_ref, *rest):
        out_ref = rest[-1]
        w_refs = rest[:-1]

        h = x_ref[...].astype(jnp.float32)
        for li, cfg in enumerate(layer_cfg):
            m = meta[li]
            if cfg["ln"]:
                rg = m["ln_g_row"]
                rb = m["ln_b_row"]
                gamma = small_ref[rg:rg + 1, :hid_pad]
                beta = small_ref[rb:rb + 1, :hid_pad]
                # One-pass stats; divisor is the REAL hidden size (padded
                # lanes of h are exactly zero, so sums are unaffected).
                s1 = jnp.sum(h, axis=-1, keepdims=True)
                s2 = jnp.sum(h * h, axis=-1, keepdims=True)
                mu = s1 * inv_h
                var = s2 * inv_h - mu * mu
                h = (h - mu) * jax.lax.rsqrt(var + 1e-5) * gamma + beta
            w = w_refs[li][...]
            fout = w.shape[1]
            rbias = m["b_row"]
            bias = small_ref[rbias:rbias + 1, :fout]
            if use_bf16:
                h = jnp.dot(h.astype(jnp.bfloat16), w.astype(jnp.bfloat16),
                            preferred_element_type=jnp.float32)
            else:
                h = jnp.dot(h, w.astype(jnp.float32),
                            preferred_element_type=jnp.float32)
            h = h + bias.astype(jnp.float32)
            if cfg["act"]:
                h = jnp.tanh(h)
        out_ref[...] = h.astype(out_ref.dtype)

    return kernel


def _choose_batch_tile(batch, spec, weight_bytes, vmem_budget):
    feat = max(spec["in_pad"], spec["hid_pad"], spec["out_pad"])
    b8 = _round_up(max(batch, 1), 8)
    candidates = [c for c in (1024, 512, 256, 128, 64, 32, 16, 8) if c <= b8]
    if not candidates:
        candidates = [8]
    for tb in candidates:
        per_step = (weight_bytes
                    + 2 * tb * spec["in_pad"] * 4     # double-buffered input
                    + 2 * tb * spec["out_pad"] * 4    # double-buffered output
                    + 4 * tb * feat * 4)              # live activations
        if per_step <= vmem_budget:
            return tb
    return candidates[-1]


def mlp_forward(x, weights, small, spec, precision="bf16", batch_tile=None):
    """x: (B, input_size). weights: list of padded (in_pad, out_pad) matrices.
    small: packed (n_small, P) biases / LN params."""
    batch, in_features = x.shape
    in_pad, out_pad = spec["in_pad"], spec["out_pad"]
    out_features = spec["output_size"]

    weight_bytes = sum(int(w.size) * 4 for w in weights) + int(small.size) * 4
    vmem_cap = _vmem_capacity_bytes()
    tb = batch_tile or _choose_batch_tile(batch, spec, weight_bytes,
                                          int(vmem_cap * 0.5))
    b_pad = _round_up(max(batch, 1), tb)

    # Zero-pad batch (to a tile multiple) and features (to 128 lanes).
    x_p = jnp.zeros((b_pad, in_pad), x.dtype).at[:batch, :in_features].set(x)

    kernel = _make_kernel(spec, use_bf16=(precision == "bf16"))

    const = lambda i: (0, 0)
    in_specs = [pl.BlockSpec((tb, in_pad), lambda i: (i, 0)),
                pl.BlockSpec(small.shape, const)]
    in_specs += [pl.BlockSpec(w.shape, const) for w in weights]
    out_specs = pl.BlockSpec((tb, out_pad), lambda i: (i, 0))

    flops = 2 * b_pad * sum(int(w.shape[0]) * int(w.shape[1]) for w in weights)
    transcend = b_pad * spec["hid_pad"] * sum(
        1 for c in spec["layer_cfg"] if c["act"])
    bytes_acc = (int(x_p.size) + int(small.size)
                 + sum(int(w.size) for w in weights)
                 + b_pad * out_pad) * 4
    cost = pl.CostEstimate(flops=flops, transcendentals=transcend,
                           bytes_accessed=bytes_acc)

    feat = max(in_pad, spec["hid_pad"], out_pad)
    est = (weight_bytes + 2 * tb * in_pad * 4 + 2 * tb * out_pad * 4
           + 4 * tb * feat * 4)
    vmem_limit = int(min(max(2 * est, 16 * 1024 * 1024), 64 * 1024 * 1024))

    out = pl.pallas_call(
        kernel,
        out_shape=jax.ShapeDtypeStruct((b_pad, out_pad), x.dtype),
        grid=(b_pad // tb,),
        in_specs=in_specs,
        out_specs=out_specs,
        compiler_params=pltpu.CompilerParams(
            dimension_semantics=("parallel",),
            vmem_limit_bytes=vmem_limit),
        cost_estimate=cost,
    )(x_p, small, *weights)

    return out[:batch, :out_features]


def mlp_reference(x, params, layer_cfg, precision="f32"):
    """Pure-JAX reference for correctness checking (unpadded params)."""
    h = x.astype(jnp.float32)
    idx = 0
    for cfg in layer_cfg:
        if cfg["ln"]:
            g, b = params[idx], params[idx + 1]
            idx += 2
            mu = jnp.mean(h, axis=-1, keepdims=True)
            var = jnp.mean((h - mu) ** 2, axis=-1, keepdims=True)
            h = (h - mu) * jax.lax.rsqrt(var + 1e-5) * g + b
        w, b = params[idx], params[idx + 1]
        idx += 2
        if precision == "bf16":
            h = jnp.dot(h.astype(jnp.bfloat16), w.astype(jnp.bfloat16),
                        preferred_element_type=jnp.float32) + b
        else:
            h = jnp.dot(h, w, preferred_element_type=jnp.float32) + b
        if cfg["act"]:
            h = jnp.tanh(h)
    return h.astype(x.dtype)


if __name__ == "__main__":
    input_size, hidden_size, output_size, num_layers = 16, 32, 8, 3
    layer_norm = True
    batch = 256  # many controller evaluations fused into one call

    key = jax.random.PRNGKey(0)
    kx, kp = jax.random.split(key)
    x = jax.random.normal(kx, (batch, input_size), jnp.float32)

    params, layer_cfg = init_mlp_params(
        kp, input_size, output_size, hidden_size, num_layers,
        layer_norm=layer_norm)
    weights, small, spec = prepare_params(
        params, layer_cfg, input_size, hidden_size, output_size)

    # f32 matmul path: tight check against the pure-JAX reference.
    run_f32 = jax.jit(functools.partial(mlp_forward, spec=spec,
                                        precision="f32"))
    out_f32 = run_f32(x, weights, small)
    jax.block_until_ready(out_f32)
    ref_f32 = mlp_reference(x, params, layer_cfg, precision="f32")
    assert out_f32.shape == (batch, output_size)
    assert jnp.allclose(out_f32, ref_f32, atol=2e-3, rtol=2e-3), "f32 mismatch"

    # bf16-matmul path (default, MXU-friendly): checked against a
    # matching-precision reference (deliberate precision tradeoff vs f32).
    run_bf16 = jax.jit(functools.partial(mlp_forward, spec=spec,
                                         precision="bf16"))
    out_bf16 = run_bf16(x, weights, small)
    jax.block_until_ready(out_bf16)
    ref_bf16 = mlp_reference(x, params, layer_cfg, precision="bf16")
    assert jnp.allclose(out_bf16, ref_bf16, atol=2e-2, rtol=2e-2), \
        "bf16 mismatch"

    print("KERNEL_OK")
</pallas_src>

<mosaic_0001>
module attributes {stable_mosaic.version = 11 : i64} {
  func.func @kernel(%arg0: i32, %arg1: memref<256x128xf32, #tpu.memory_space<vmem>>, %arg2: memref<8x128xf32, #tpu.memory_space<vmem>>, %arg3: memref<128x128xf32, #tpu.memory_space<vmem>>, %arg4: memref<128x128xf32, #tpu.memory_space<vmem>>, %arg5: memref<128x128xf32, #tpu.memory_space<vmem>>, %arg6: memref<128x128xf32, #tpu.memory_space<vmem>>, %arg7: memref<256x128xf32, #tpu.memory_space<vmem>>) attributes {dimension_semantics = [#tpu.dimension_semantics<parallel>], iteration_bounds = array<i64: 1>, scalar_prefetch = 0 : i64, scratch_operands = 0 : i64, tpu.core_type = #tpu.core_type<tc>, window_params = [{transform_indices = @transform_0, window_bounds = array<i64: 256, 128>}, {pipeline_mode = #tpu.pipeline_mode<synchronous>, transform_indices = @transform_1, window_bounds = array<i64: 8, 128>}, {pipeline_mode = #tpu.pipeline_mode<synchronous>, transform_indices = @transform_2, window_bounds = array<i64: 128, 128>}, {pipeline_mode = #tpu.pipeline_mode<synchronous>, transform_indices = @transform_3, window_bounds = array<i64: 128, 128>}, {pipeline_mode = #tpu.pipeline_mode<synchronous>, transform_indices = @transform_4, window_bounds = array<i64: 128, 128>}, {pipeline_mode = #tpu.pipeline_mode<synchronous>, transform_indices = @transform_5, window_bounds = array<i64: 128, 128>}, {transform_indices = @transform_6, window_bounds = array<i64: 256, 128>}]} {
    %c0 = arith.constant 0 : index
    %c0_0 = arith.constant 0 : index
    %0 = vector.load %arg1[%c0, %c0_0] : memref<256x128xf32, #tpu.memory_space<vmem>>, vector<256x128xf32>
    %c0_1 = arith.constant 0 : index
    %c0_2 = arith.constant 0 : index
    %1 = vector.load %arg3[%c0_1, %c0_2] : memref<128x128xf32, #tpu.memory_space<vmem>>, vector<128x128xf32>
    %c0_3 = arith.constant 0 : index
    %c0_4 = arith.constant 0 : index
    %2 = vector.load %arg2[%c0_3, %c0_4] : memref<8x128xf32, #tpu.memory_space<vmem>>, vector<1x128xf32>
    %cst = arith.constant dense<0.000000e+00> : vector<256x128xf32>
    %3 = tpu.matmul %0, %1, %cst {dimension_numbers = #tpu.dot_dimension_numbers<[1], [0], [0], [1], [0, 0, 1, 1], [], []>} : vector<256x128xf32>, vector<128x128xf32>, vector<256x128xf32> -> vector<256x128xf32>
    %4 = vector.broadcast %2 : vector<1x128xf32> to vector<256x128xf32>
    %5 = arith.addf %3, %4 : vector<256x128xf32>
    %6 = math.tanh %5 : vector<256x128xf32>
    %c1 = arith.constant 1 : index
    %c0_5 = arith.constant 0 : index
    %7 = vector.load %arg2[%c1, %c0_5] : memref<8x128xf32, #tpu.memory_space<vmem>>, vector<1x128xf32>
    %c2 = arith.constant 2 : index
    %c0_6 = arith.constant 0 : index
    %8 = vector.load %arg2[%c2, %c0_6] : memref<8x128xf32, #tpu.memory_space<vmem>>, vector<1x128xf32>
    %cst_7 = arith.constant dense<0.000000e+00> : vector<256xf32>
    %9 = vector.multi_reduction <add>, %6, %cst_7 [1] : vector<256x128xf32> to vector<256xf32>
    %10 = vector.shape_cast %9 : vector<256xf32> to vector<256x1xf32>
    %11 = arith.mulf %6, %6 : vector<256x128xf32>
    %cst_8 = arith.constant dense<0.000000e+00> : vector<256xf32>
    %12 = vector.multi_reduction <add>, %11, %cst_8 [1] : vector<256x128xf32> to vector<256xf32>
    %13 = vector.shape_cast %12 : vector<256xf32> to vector<256x1xf32>
    %cst_9 = arith.constant 3.125000e-02 : f32
    %14 = vector.broadcast %cst_9 : f32 to vector<256x1xf32>
    %15 = arith.mulf %10, %14 : vector<256x1xf32>
    %cst_10 = arith.constant 3.125000e-02 : f32
    %16 = vector.broadcast %cst_10 : f32 to vector<256x1xf32>
    %17 = arith.mulf %13, %16 : vector<256x1xf32>
    %18 = arith.mulf %15, %15 : vector<256x1xf32>
    %19 = arith.subf %17, %18 : vector<256x1xf32>
    %20 = vector.broadcast %15 : vector<256x1xf32> to vector<256x128xf32>
    %21 = arith.subf %6, %20 : vector<256x128xf32>
    %cst_11 = arith.constant 9.99999974E-6 : f32
    %22 = vector.broadcast %cst_11 : f32 to vector<256x1xf32>
    %23 = arith.addf %19, %22 : vector<256x1xf32>
    %24 = math.rsqrt %23 : vector<256x1xf32>
    %25 = vector.broadcast %24 : vector<256x1xf32> to vector<256x128xf32>
    %26 = arith.mulf %21, %25 : vector<256x128xf32>
    %27 = vector.broadcast %7 : vector<1x128xf32> to vector<256x128xf32>
    %28 = arith.mulf %26, %27 : vector<256x128xf32>
    %29 = vector.broadcast %8 : vector<1x128xf32> to vector<256x128xf32>
    %30 = arith.addf %28, %29 : vector<256x128xf32>
    %c0_12 = arith.constant 0 : index
    %c0_13 = arith.constant 0 : index
    %31 = vector.load %arg4[%c0_12, %c0_13] : memref<128x128xf32, #tpu.memory_space<vmem>>, vector<128x128xf32>
    %c3 = arith.constant 3 : index
    %c0_14 = arith.constant 0 : index
    %32 = vector.load %arg2[%c3, %c0_14] : memref<8x128xf32, #tpu.memory_space<vmem>>, vector<1x128xf32>
    %cst_15 = arith.constant dense<0.000000e+00> : vector<256x128xf32>
    %33 = tpu.matmul %30, %31, %cst_15 {dimension_numbers = #tpu.dot_dimension_numbers<[1], [0], [0], [1], [0, 0, 1, 1], [], []>} : vector<256x128xf32>, vector<128x128xf32>, vector<256x128xf32> -> vector<256x128xf32>
    %34 = vector.broadcast %32 : vector<1x128xf32> to vector<256x128xf32>
    %35 = arith.addf %33, %34 : vector<256x128xf32>
    %36 = math.tanh %35 : vector<256x128xf32>
    %c4 = arith.constant 4 : index
    %c0_16 = arith.constant 0 : index
    %37 = vector.load %arg2[%c4, %c0_16] : memref<8x128xf32, #tpu.memory_space<vmem>>, vector<1x128xf32>
    %c5 = arith.constant 5 : index
    %c0_17 = arith.constant 0 : index
    %38 = vector.load %arg2[%c5, %c0_17] : memref<8x128xf32, #tpu.memory_space<vmem>>, vector<1x128xf32>
    %cst_18 = arith.constant dense<0.000000e+00> : vector<256xf32>
    %39 = vector.multi_reduction <add>, %36, %cst_18 [1] : vector<256x128xf32> to vector<256xf32>
    %40 = vector.shape_cast %39 : vector<256xf32> to vector<256x1xf32>
    %41 = arith.mulf %36, %36 : vector<256x128xf32>
    %cst_19 = arith.constant dense<0.000000e+00> : vector<256xf32>
    %42 = vector.multi_reduction <add>, %41, %cst_19 [1] : vector<256x128xf32> to vector<256xf32>
    %43 = vector.shape_cast %42 : vector<256xf32> to vector<256x1xf32>
    %cst_20 = arith.constant 3.125000e-02 : f32
    %44 = vector.broadcast %cst_20 : f32 to vector<256x1xf32>
    %45 = arith.mulf %40, %44 : vector<256x1xf32>
    %cst_21 = arith.constant 3.125000e-02 : f32
    %46 = vector.broadcast %cst_21 : f32 to vector<256x1xf32>
    %47 = arith.mulf %43, %46 : vector<256x1xf32>
    %48 = arith.mulf %45, %45 : vector<256x1xf32>
    %49 = arith.subf %47, %48 : vector<256x1xf32>
    %50 = vector.broadcast %45 : vector<256x1xf32> to vector<256x128xf32>
    %51 = arith.subf %36, %50 : vector<256x128xf32>
    %cst_22 = arith.constant 9.99999974E-6 : f32
    %52 = vector.broadcast %cst_22 : f32 to vector<256x1xf32>
    %53 = arith.addf %49, %52 : vector<256x1xf32>
    %54 = math.rsqrt %53 : vector<256x1xf32>
    %55 = vector.broadcast %54 : vector<256x1xf32> to vector<256x128xf32>
    %56 = arith.mulf %51, %55 : vector<256x128xf32>
    %57 = vector.broadcast %37 : vector<1x128xf32> to vector<256x128xf32>
    %58 = arith.mulf %56, %57 : vector<256x128xf32>
    %59 = vector.broadcast %38 : vector<1x128xf32> to vector<256x128xf32>
    %60 = arith.addf %58, %59 : vector<256x128xf32>
    %c0_23 = arith.constant 0 : index
    %c0_24 = arith.constant 0 : index
    %61 = vector.load %arg5[%c0_23, %c0_24] : memref<128x128xf32, #tpu.memory_space<vmem>>, vector<128x128xf32>
    %c6 = arith.constant 6 : index
    %c0_25 = arith.constant 0 : index
    %62 = vector.load %arg2[%c6, %c0_25] : memref<8x128xf32, #tpu.memory_space<vmem>>, vector<1x128xf32>
    %cst_26 = arith.constant dense<0.000000e+00> : vector<256x128xf32>
    %63 = tpu.matmul %60, %61, %cst_26 {dimension_numbers = #tpu.dot_dimension_numbers<[1], [0], [0], [1], [0, 0, 1, 1], [], []>} : vector<256x128xf32>, vector<128x128xf32>, vector<256x128xf32> -> vector<256x128xf32>
    %64 = vector.broadcast %62 : vector<1x128xf32> to vector<256x128xf32>
    %65 = arith.addf %63, %64 : vector<256x128xf32>
    %66 = math.tanh %65 : vector<256x128xf32>
    %c0_27 = arith.constant 0 : index
    %c0_28 = arith.constant 0 : index
    %67 = vector.load %arg6[%c0_27, %c0_28] : memref<128x128xf32, #tpu.memory_space<vmem>>, vector<128x128xf32>
    %c7 = arith.constant 7 : index
    %c0_29 = arith.constant 0 : index
    %68 = vector.load %arg2[%c7, %c0_29] : memref<8x128xf32, #tpu.memory_space<vmem>>, vector<1x128xf32>
    %cst_30 = arith.constant dense<0.000000e+00> : vector<256x128xf32>
    %69 = tpu.matmul %66, %67, %cst_30 {dimension_numbers = #tpu.dot_dimension_numbers<[1], [0], [0], [1], [0, 0, 1, 1], [], []>} : vector<256x128xf32>, vector<128x128xf32>, vector<256x128xf32> -> vector<256x128xf32>
    %70 = vector.broadcast %68 : vector<1x128xf32> to vector<256x128xf32>
    %71 = arith.addf %69, %70 : vector<256x128xf32>
    %c0_31 = arith.constant 0 : index
    %c0_32 = arith.constant 0 : index
    %72 = vector.load %arg7[%c0_31, %c0_32] : memref<256x128xf32, #tpu.memory_space<vmem>>, vector<256x128xf32>
    tpu.vector_store %arg7[%c0_31, %c0_32], %71 {strides = array<i32>} : memref<256x128xf32, #tpu.memory_space<vmem>>, vector<256x128xf32>,
    return
  }
  func.func @transform_0(%arg0: i32) -> (i32, i32) {
    %c0_i32 = arith.constant 0 : i32
    %c0_i32_0 = arith.constant 0 : i32
    return %arg0, %c0_i32 : i32, i32
  }
  func.func @transform_1(%arg0: i32) -> (i32, i32) {
    %c0_i32 = arith.constant 0 : i32
    %c0_i32_0 = arith.constant 0 : i32
    %c0_i32_1 = arith.constant 0 : i32
    return %c0_i32, %c0_i32_0 : i32, i32
  }
  func.func @transform_2(%arg0: i32) -> (i32, i32) {
    %c0_i32 = arith.constant 0 : i32
    %c0_i32_0 = arith.constant 0 : i32
    %c0_i32_1 = arith.constant 0 : i32
    return %c0_i32, %c0_i32_0 : i32, i32
  }
  func.func @transform_3(%arg0: i32) -> (i32, i32) {
    %c0_i32 = arith.constant 0 : i32
    %c0_i32_0 = arith.constant 0 : i32
    %c0_i32_1 = arith.constant 0 : i32
    return %c0_i32, %c0_i32_0 : i32, i32
  }
  func.func @transform_4(%arg0: i32) -> (i32, i32) {
    %c0_i32 = arith.constant 0 : i32
    %c0_i32_0 = arith.constant 0 : i32
    %c0_i32_1 = arith.constant 0 : i32
    return %c0_i32, %c0_i32_0 : i32, i32
  }
  func.func @transform_5(%arg0: i32) -> (i32, i32) {
    %c0_i32 = arith.constant 0 : i32
    %c0_i32_0 = arith.constant 0 : i32
    %c0_i32_1 = arith.constant 0 : i32
    return %c0_i32, %c0_i32_0 : i32, i32
  }
  func.func @transform_6(%arg0: i32) -> (i32, i32) {
    %c0_i32 = arith.constant 0 : i32
    %c0_i32_0 = arith.constant 0 : i32
    return %arg0, %c0_i32 : i32, i32
  }
}

</mosaic_0001>

<bundles_post_ra>
// kernel: mlp_forward.1
= control target key start
LH: loop header
LB: loop body
LE: loop exit
PB: predicated region body
PF: predicated region fallthrough
CT: control target
= control target key end

     0   :  { %s4543_s2 = inlined_call_operand.vmem [shape: f32[128,128], index: 2, kind: input, shape index: {}]   ;;  %s4544_s0 = inlined_call_operand.vmem [shape: f32[256,128], index: 0, kind: input, shape index: {}]   ;;  %s4545_s1 = inlined_call_operand.vmem [shape: f32[8,128], index: 1, kind: input, shape index: {}]   ;;  %s4546_s3 = inlined_call_operand.vmem [shape: f32[128,128], index: 3, kind: input, shape index: {}]   ;;  %s4547_s4 = inlined_call_operand.vmem [shape: f32[128,128], index: 4, kind: input, shape index: {}]   ;;  %s4548_s5 = inlined_call_operand.vmem [shape: f32[128,128], index: 5, kind: input, shape index: {}]   ;;  %s4549_s6 = inlined_call_operand.vmem [shape: f32[256,128], index: 6, kind: output, shape index: {}]  }
   0x1   :  { %v55_v0 = vld [vmem:[%s4543_s2] sm:$0xff]  ;;  %v56_v1 = vld [vmem:[%s4543_s2 + $0x8] sm:$0xff]  ;;  %v57_v2 = vld [vmem:[%s4543_s2 + $0x10] sm:$0xff] }
   0x2   :  { %v2671_v3 = vpack.c.bf16 %v56_v1, %v55_v0  ;;  %v58_v4 = vld [vmem:[%s4543_s2 + $0x18] sm:$0xff]  ;;  %v59_v6 = vld [vmem:[%s4543_s2 + $0x20] sm:$0xff]  ;;  %v60_v7 = vld [vmem:[%s4543_s2 + $0x28] sm:$0xff] }
   0x3   :  { %v2675_v5 = vpack.c.bf16 %v58_v4, %v57_v2  ;;  %v2679_v8 = vpack.c.bf16 %v60_v7, %v59_v6  ;;  %v23_v9 = vld [vmem:[%s4544_s0] sm:$0xff]  ;;  %v61_v10 = vld [vmem:[%s4543_s2 + $0x30] sm:$0xff]  ;;  %v62_v11 = vld [vmem:[%s4543_s2 + $0x38] sm:$0xff] }
   0x4   :  { %2672 = vmatprep.subr.bf16.mxu0 %v2671_v3  ;;  %2383 = vmatprep.mubr.f32.mxu0 %v23_v9  ;;  %v2683_v12 = vpack.c.bf16 %v62_v11, %v61_v10  ;;  %v63_v13 = vld [vmem:[%s4543_s2 + $0x40] sm:$0xff]  ;;  %v64_v14 = vld [vmem:[%s4543_s2 + $0x48] sm:$0xff]  ;;  %v65_v16 = vld [vmem:[%s4543_s2 + $0x50] sm:$0xff] }
   0x5   :  { %2674 = vmatpush3.bf16.msra.mxu0 %v2671_v3  ;;  %v2687_v15 = vpack.c.bf16 %v64_v14, %v63_v13  ;;  %v66_v17 = vld [vmem:[%s4543_s2 + $0x58] sm:$0xff]  ;;  %v67_v19 = vld [vmem:[%s4543_s2 + $0x60] sm:$0xff]  ;;  %v68_v20 = vld [vmem:[%s4543_s2 + $0x68] sm:$0xff] }
   0x6   :  { %2676 = vmatprep.subr.bf16.mxu0 %v2675_v5  ;;  %v2691_v18 = vpack.c.bf16 %v66_v17, %v65_v16  ;;  %v2695_v21 = vpack.c.bf16 %v68_v20, %v67_v19  ;;  %v69_v22 = vld [vmem:[%s4543_s2 + $0x70] sm:$0xff]  ;;  %v70_v23 = vld [vmem:[%s4543_s2 + $0x78] sm:$0xff]  ;;  %v24_v25 = vld [vmem:[%s4544_s0 + $0x8] sm:$0xff] }
   0x7   :  { %v2699_v24 = vpack.c.bf16 %v70_v23, %v69_v22  ;;  %v25_v26 = vld [vmem:[%s4544_s0 + $0x10] sm:$0xff]  ;;  %v26_v27 = vld [vmem:[%s4544_s0 + $0x18] sm:$0xff]  ;;  %v27_v28 = vld [vmem:[%s4544_s0 + $0x20] sm:$0xff] }
   0x8   :  { %v28_v29 = vld [vmem:[%s4544_s0 + $0x28] sm:$0xff]  ;;  %v29_v30 = vld [vmem:[%s4544_s0 + $0x30] sm:$0xff]  ;;  %v30_v31 = vld [vmem:[%s4544_s0 + $0x38] sm:$0xff] }
   0x9   :  { %2678 = vmatpush3.bf16.msra.mxu0 %v2675_v5  ;;  %v31_v32 = vld [vmem:[%s4544_s0 + $0x40] sm:$0xff]  ;;  %v32_v33 = vld [vmem:[%s4544_s0 + $0x48] sm:$0xff]  ;;  %v33_v34 = vld [vmem:[%s4544_s0 + $0x50] sm:$0xff] }
   0xa   :  { %2680 = vmatprep.subr.bf16.mxu0 %v2679_v8  ;;  %v34_v35 = vld [vmem:[%s4544_s0 + $0x58] sm:$0xff]  ;;  %v35_v36 = vld [vmem:[%s4544_s0 + $0x60] sm:$0xff]  ;;  %v36_v37 = vld [vmem:[%s4544_s0 + $0x68] sm:$0xff] }
   0xb   :  { %v37_v38 = vld [vmem:[%s4544_s0 + $0x70] sm:$0xff]  ;;  %v38_v39 = vld [vmem:[%s4544_s0 + $0x78] sm:$0xff]  ;;  %v39_v40 = vld [vmem:[%s4544_s0 + $0x80] sm:$0xff] }
   0xc   :  { %v40_v41 = vld [vmem:[%s4544_s0 + $0x88] sm:$0xff]  ;;  %v41_v42 = vld [vmem:[%s4544_s0 + $0x90] sm:$0xff]  ;;  %v42_v43 = vld [vmem:[%s4544_s0 + $0x98] sm:$0xff] }
   0xd   :  { %2682 = vmatpush3.bf16.msra.mxu0 %v2679_v8  ;;  %v43_v44 = vld [vmem:[%s4544_s0 + $0xa0] sm:$0xff]  ;;  %v44_v45 = vld [vmem:[%s4544_s0 + $0xa8] sm:$0xff]  ;;  %v45_v46 = vld [vmem:[%s4544_s0 + $0xb0] sm:$0xff] }
   0xe   :  { %2684 = vmatprep.subr.bf16.mxu0 %v2683_v12  ;;  %v46_v47 = vld [vmem:[%s4544_s0 + $0xb8] sm:$0xff]  ;;  %v47_v48 = vld [vmem:[%s4544_s0 + $0xc0] sm:$0xff]  ;;  %v48_v49 = vld [vmem:[%s4544_s0 + $0xc8] sm:$0xff] }
   0xf   :  { %v49_v50 = vld [vmem:[%s4544_s0 + $0xd0] sm:$0xff]  ;;  %v50_v51 = vld [vmem:[%s4544_s0 + $0xd8] sm:$0xff]  ;;  %v51_v52 = vld [vmem:[%s4544_s0 + $0xe0] sm:$0xff] }
  0x10   :  { %v52_v53 = vld [vmem:[%s4544_s0 + $0xe8] sm:$0xff]  ;;  %v53_v54 = vld [vmem:[%s4544_s0 + $0xf0] sm:$0xff]  ;;  %v54_v55 = vld [vmem:[%s4544_s0 + $0xf8] sm:$0xff] }
  0x11   :  { %2686 = vmatpush3.bf16.msra.mxu0 %v2683_v12  ;;  %v3301_v56 = vld [vmem:[%s4545_s1] ss:$0 sm:$0xff]  ;;  %v824_v8 = vld [vmem:[%s4546_s3 + $0x8] sm:$0xff] }
  0x12   :  { %2688 = vmatprep.subr.bf16.mxu0 %v2687_v15  ;;  %v823_v7 = vld [vmem:[%s4546_s3] sm:$0xff] }
  0x13   :  { %v2703_v10 = vpack.c.bf16 %v824_v8, %v823_v7 }
  0x15   :  { %2690 = vmatpush3.bf16.msra.mxu0 %v2687_v15  ;;  %2704 = vmatprep.subr.bf16.mxu1 %v2703_v10 }
  0x16   :  { %2692 = vmatprep.subr.bf16.mxu0 %v2691_v18  ;;  %2706 = vmatpush3.bf16.msra.mxu1 %v2703_v10 }
  0x19   :  { %2694 = vmatpush3.bf16.msra.mxu0 %v2691_v18 }
  0x1a   :  { %2696 = vmatprep.subr.bf16.mxu0 %v2695_v21 }
  0x1d   :  { %2698 = vmatpush3.bf16.msra.mxu0 %v2695_v21 }
  0x1e   :  { %2700 = vmatprep.subr.bf16.mxu0 %v2699_v24 }
  0x21   :  { %2702 = vmatpush3.bf16.msra.mxu0 %v2699_v24 }
  0x24   :  { %2384 = vmatmul.mubr.f32.vlgmr.msra.gmra.mrb[0].mxu0 %v24_v25 }
  0x25   :  { %2386 = vmatprep.mubr.f32.mxu0 %v25_v26 }
  0x28   :  { %2387 = vmatmul.mubr.f32.gmra.mrb[2].mxu0 %v26_v27  ;;  %v825_v27 = vld [vmem:[%s4546_s3 + $0x10] sm:$0xff] }
  0x29   :  { %2389 = vmatprep.mubr.f32.mxu0 %v27_v28  ;;  %v826_v28 = vld [vmem:[%s4546_s3 + $0x18] sm:$0xff] }
  0x2c   :  { %2390 = vmatmul.mubr.f32.gmra.mrb[4].mxu0 %v28_v29 }
  0x2d   :  { %2392 = vmatprep.mubr.f32.mxu0 %v29_v30  ;;  %v2707_v30 = vpack.c.bf16 %v826_v28, %v825_v27  ;;  %v837_v28 = vld [vmem:[%s4546_s3 + $0x70] sm:$0xff] }
  0x2f   :  { %2708 = vmatprep.subr.bf16.mxu1 %v2707_v30 }
  0x30   :  { %2393 = vmatmul.mubr.f32.gmra.mrb[6].mxu0 %v30_v31  ;;  %2710 = vmatpush3.bf16.msra.mxu1 %v2707_v30  ;;  %v838_v30 = vld [vmem:[%s4546_s3 + $0x78] sm:$0xff] }
  0x31   :  { %2395 = vmatprep.mubr.f32.mxu0 %v31_v32 }
  0x34   :  { %2396 = vmatmul.mubr.f32.gmra.mrb[8].mxu0 %v32_v33 }
  0x35   :  { %2398 = vmatprep.mubr.f32.mxu0 %v33_v34 }
  0x38   :  { %2399 = vmatmul.mubr.f32.gmra.mrb[10].mxu0 %v34_v35 }
  0x39   :  { %2401 = vmatprep.mubr.f32.mxu0 %v35_v36  ;;  %v827_v36 = vld [vmem:[%s4546_s3 + $0x20] sm:$0xff] }
  0x3c   :  { %2402 = vmatmul.mubr.f32.gmra.mrb[12].mxu0 %v36_v37  ;;  %v828_v37 = vld [vmem:[%s4546_s3 + $0x28] sm:$0xff] }
  0x3d   :  { %2404 = vmatprep.mubr.f32.mxu0 %v37_v38 }
  0x40   :  { %2405 = vmatmul.mubr.f32.gmra.mrb[14].mxu0 %v38_v39  ;;  %v2711_v39 = vpack.c.bf16 %v828_v37, %v827_v36  ;;  %v2731_v37 = vpack.c.bf16 %v838_v30, %v837_v28 }
  0x41   :  { %2407 = vmatprep.mubr.f32.mxu0 %v39_v40 }
  0x42   :  { %2712 = vmatprep.subr.bf16.mxu1 %v2711_v39 }
  0x43   :  { %2714 = vmatpush3.bf16.msra.mxu1 %v2711_v39 }
  0x44   :  { %2408 = vmatmul.mubr.f32.gmra.mrb[16].mxu0 %v40_v41 }
  0x45   :  { %2410 = vmatprep.mubr.f32.mxu0 %v41_v42 }
  0x48   :  { %2411 = vmatmul.mubr.f32.gmra.mrb[18].mxu0 %v42_v43 }
  0x49   :  { %2413 = vmatprep.mubr.f32.mxu0 %v43_v44 }
  0x4c   :  { %2414 = vmatmul.mubr.f32.gmra.mrb[20].mxu0 %v44_v45  ;;  %v829_v45 = vld [vmem:[%s4546_s3 + $0x30] sm:$0xff] }
  0x4d   :  { %2416 = vmatprep.mubr.f32.mxu0 %v45_v46  ;;  %v830_v46 = vld [vmem:[%s4546_s3 + $0x38] sm:$0xff] }
  0x50   :  { %2417 = vmatmul.mubr.f32.gmra.mrb[22].mxu0 %v46_v47 }
  0x51   :  { %2419 = vmatprep.mubr.f32.mxu0 %v47_v48  ;;  %v2715_v48 = vpack.c.bf16 %v830_v46, %v829_v45 }
  0x53   :  { %2716 = vmatprep.subr.bf16.mxu1 %v2715_v48 }
  0x54   :  { %2420 = vmatmul.mubr.f32.gmra.mrb[24].mxu0 %v48_v49  ;;  %2718 = vmatpush3.bf16.msra.mxu1 %v2715_v48 }
  0x55   :  { %2422 = vmatprep.mubr.f32.mxu0 %v49_v50 }
  0x58   :  { %2423 = vmatmul.mubr.f32.gmra.mrb[26].mxu0 %v50_v51 }
  0x59   :  { %2425 = vmatprep.mubr.f32.mxu0 %v51_v52 }
  0x5c   :  { %2426 = vmatmul.mubr.f32.gmra.mrb[28].mxu0 %v52_v53 }
  0x5d   :  { %2428 = vmatprep.mubr.f32.mxu0 %v53_v54 }
  0x60   :  { %2429 = vmatmul.mubr.f32.gmra.mrb[30].mxu0 %v54_v55 }
  0xf7   :  { %v2385_v57 = vpop.f32.mrb[0].mxu0 }
  0xf8   :  { %v148_v58 = vadd.f32 %v2385_v57, %v3301_v56  ;;  %v142_v59 = vpop.f32.mrb[1].mxu0  ;;  %v831_v57 = vld [vmem:[%s4546_s3 + $0x40] sm:$0xff] }
  0xf9   :  { %v143_v60 = vadd.f32 %v3301_v56, %v142_v59 }
  0xfa   :  { %2799 = vtanh.f32 %v148_v58  ;;  %v832_v58 = vld [vmem:[%s4546_s3 + $0x48] sm:$0xff] }
  0xfb   :  { %v2388_v61 = vpop.f32.mrb[2].mxu0  ;;  %2801 = vtanh.f32 %v143_v60  ;;  %v2719_v60 = vpack.c.bf16 %v832_v58, %v831_v57 }
  0xfc   :  { %v152_v62 = vpop.f32.mrb[3].mxu0  ;;  %v158_v0 = vadd.f32 %v2388_v61, %v3301_v56 }
  0xfd   :  { %v153_v63 = vadd.f32 %v3301_v56, %v152_v62  ;;  %2720 = vmatprep.subr.bf16.mxu1 %v2719_v60 }
  0xfe   :  { %2722 = vmatpush3.bf16.msra.mxu1 %v2719_v60 }
  0xff   :  { %v2391_v1 = vpop.f32.mrb[4].mxu0  ;;  %2803 = vtanh.f32 %v153_v63 }
 0x100   :  { %v162_v2 = vpop.f32.mrb[5].mxu0  ;;  %2805 = vtanh.f32 %v158_v0  ;;  %v168_v12 = vadd.f32 %v2391_v1, %v3301_v56 }
 0x101   :  { %v163_v5 = vadd.f32 %v3301_v56, %v162_v2 }
 0x103   :  { %v2394_v3 = vpop.f32.mrb[6].mxu0  ;;  %2807 = vtanh.f32 %v163_v5  ;;  %v834_v5 = vld [vmem:[%s4546_s3 + $0x58] sm:$0xff] }
 0x104   :  { %v3307_v4 = vpop.eup %2799  ;;  %v172_v6 = vpop.f32.mrb[7].mxu0  ;;  %2809 = vtanh.f32 %v168_v12  ;;  %v178_v22 = vadd.f32 %v2394_v3, %v3301_v56  ;;  %v833_v3 = vld [vmem:[%s4546_s3 + $0x50] sm:$0xff] }
 0x105   :  { %337 = vadd.xlane.f32.xlu0 %v3307_v4  ;;  %v400_v9 = vmul.f32 %v3307_v4, %v3307_v4  ;;  %v3319_v11 = vpop.eup %2801  ;;  %v173_v19 = vadd.f32 %v3301_v56, %v172_v6  ;;  %v2723_v10 = vpack.c.bf16 %v834_v5, %v833_v3 }
 0x106   :  { %v399_v15 = vmul.f32 %v3319_v11, %v3319_v11 }
 0x107   :  { %433 = vadd.xlane.f32.xlu1 %v400_v9  ;;  %v2397_v13 = vpop.f32.mrb[8].mxu0  ;;  %2811 = vtanh.f32 %v173_v19  ;;  %2724 = vmatprep.subr.bf16.mxu1 %v2723_v10  ;;  %v836_v19 = vld [vmem:[%s4546_s3 + $0x68] sm:$0xff] }
 0x108   :  { %v182_v14 = vpop.f32.mrb[9].mxu0  ;;  %2813 = vtanh.f32 %v178_v22  ;;  %v188_v35 = vadd.f32 %v2397_v13, %v3301_v56  ;;  %2726 = vmatpush3.bf16.msra.mxu1 %v2723_v10 }
 0x109   :  { %335 = vadd.xlane.f32.xlu0 %v3319_v11  ;;  %v3325_v16 = vpop.eup %2803  ;;  %v183_v32 = vadd.f32 %v3301_v56, %v182_v14 }
 0x10a   :  { %v3327_v18 = vpop.eup %2805  ;;  %v401_v21 = vmul.f32 %v3325_v16, %v3325_v16 }
 0x10b   :  { %431 = vadd.xlane.f32.xlu1 %v399_v15  ;;  %v2400_v17 = vpop.f32.mrb[10].mxu0  ;;  %v402_v25 = vmul.f32 %v3327_v18, %v3327_v18  ;;  %2815 = vtanh.f32 %v183_v32 }
 0x10c   :  { %v192_v20 = vpop.f32.mrb[11].mxu0  ;;  %2817 = vtanh.f32 %v188_v35  ;;  %v198_v55 = vadd.f32 %v2400_v17, %v3301_v56  ;;  %v835_v17 = vld [vmem:[%s4546_s3 + $0x60] sm:$0xff] }
 0x10d   :  { %339 = vadd.xlane.f32.xlu0 %v3325_v16  ;;  %v3341_v26 = vpop.eup %2807  ;;  %v193_v50 = vadd.f32 %v3301_v56, %v192_v20  ;;  %v2727_v22 = vpack.c.bf16 %v836_v19, %v835_v17 }
 0x10e   :  { %v3351_v31 = vpop.eup %2809  ;;  %v403_v34 = vmul.f32 %v3341_v26, %v3341_v26 }
 0x10f   :  { %341 = vadd.xlane.f32.xlu1 %v3327_v18  ;;  %v3335_v23 = vpop.f32.mrb[12].mxu0  ;;  %v404_v42 = vmul.f32 %v3351_v31, %v3351_v31  ;;  %2819 = vtanh.f32 %v193_v50  ;;  %2728 = vmatprep.subr.bf16.mxu1 %v2727_v22 }
 0x110   :  { %v3337_v24 = vpop.f32.mrb[13].mxu0  ;;  %2821 = vtanh.f32 %v198_v55  ;;  %v208_v14 = vadd.f32 %v3335_v23, %v3301_v56  ;;  %2730 = vmatpush3.bf16.msra.mxu1 %v2727_v22 }
 0x111   :  { %435 = vadd.xlane.f32.xlu0 %v401_v21  ;;  %v3375_v44 = vpop.eup %2811  ;;  %v203_v7 = vadd.f32 %v3301_v56, %v3337_v24  ;;  %2732 = vmatprep.subr.bf16.mxu1 %v2731_v37 }
 0x112   :  { %v3383_v49 = vpop.eup %2813  ;;  %v405_v53 = vmul.f32 %v3375_v44, %v3375_v44 }
 0x113   :  { %437 = vadd.xlane.f32.xlu1 %v402_v25  ;;  %v3349_v29 = vpop.f32.mrb[14].mxu0  ;;  %v406_v63 = vmul.f32 %v3383_v49, %v3383_v49  ;;  %2823 = vtanh.f32 %v203_v7 }
 0x114   :  { %v3354_v33 = vpop.f32.mrb[15].mxu0  ;;  %2825 = vtanh.f32 %v208_v14  ;;  %2734 = vmatpush3.bf16.msra.mxu1 %v2731_v37 }
 0x115   :  { %343 = vadd.xlane.f32.xlu0 %v3341_v26  ;;  %v3411_v1 = vpop.eup %2815 }
 0x116   :  { %v3419_v6 = vpop.eup %2817  ;;  %v407_v12 = vmul.f32 %v3411_v1, %v3411_v1 }
 0x117   :  { %345 = vadd.xlane.f32.xlu1 %v3351_v31  ;;  %v2409_v38 = vpop.f32.mrb[16].mxu0  ;;  %v408_v23 = vmul.f32 %v3419_v6, %v3419_v6 }
 0x118   :  { %v3368_v40 = vadd.f32 %v2409_v38, %v3301_v56  ;;  %v222_v41 = vpop.f32.mrb[17].mxu0 }
 0x119   :  { %439 = vadd.xlane.f32.xlu0 %v403_v34  ;;  %v3373_v43 = vadd.f32 %v3301_v56, %v222_v41  ;;  %v3449_v25 = vpop.eup %2819  ;;  %v213_v34 = vadd.f32 %v3301_v56, %v3354_v33  ;;  %v218_v41 = vadd.f32 %v3349_v29, %v3301_v56 }
 0x11a   :  { %v3457_v32 = vpop.eup %2821  ;;  %v409_v38 = vmul.f32 %v3449_v25, %v3449_v25 }
 0x11b   :  { %441 = vadd.xlane.f32.xlu1 %v404_v42  ;;  %v2412_v47 = vpop.f32.mrb[18].mxu0  ;;  %2827 = vtanh.f32 %v213_v34  ;;  %v410_v46 = vmul.f32 %v3457_v32, %v3457_v32 }
 0x11c   :  { %v3387_v51 = vadd.f32 %v2412_v47, %v3301_v56  ;;  %v232_v52 = vpop.f32.mrb[19].mxu0  ;;  %2829 = vtanh.f32 %v218_v41 }
 0x11d   :  { %347 = vadd.xlane.f32.xlu0 %v3375_v44  ;;  %v3393_v54 = vadd.f32 %v3301_v56, %v232_v52  ;;  %v3481_v48 = vpop.eup %2823  ;;  %2831 = vtanh.f32 %v3373_v43 }
 0x11e   :  { %v3483_v50 = vpop.eup %2825  ;;  %v411_v55 = vmul.f32 %v3481_v48, %v3481_v48  ;;  %2833 = vtanh.f32 %v3368_v40 }
 0x11f   :  { %349 = vadd.xlane.f32.xlu1 %v3383_v49  ;;  %v2415_v59 = vpop.f32.mrb[20].mxu0  ;;  %v412_v58 = vmul.f32 %v3483_v50, %v3483_v50  ;;  %2835 = vtanh.f32 %v3393_v54 }
 0x120   :  { %v3404_v61 = vadd.f32 %v2415_v59, %v3301_v56  ;;  %v242_v62 = vpop.f32.mrb[21].mxu0  ;;  %2837 = vtanh.f32 %v3387_v51 }
 0x121   :  { %443 = vadd.xlane.f32.xlu0 %v405_v53  ;;  %v3409_v0 = vadd.f32 %v3301_v56, %v242_v62 }
 0x123   :  { %445 = vadd.xlane.f32.xlu1 %v406_v63  ;;  %v2418_v2 = vpop.f32.mrb[22].mxu0  ;;  %2839 = vtanh.f32 %v3409_v0 }
 0x124   :  { %v3424_v8 = vadd.f32 %v2418_v2, %v3301_v56  ;;  %v252_v9 = vpop.f32.mrb[23].mxu0  ;;  %2841 = vtanh.f32 %v3404_v61 }
 0x125   :  { %351 = vadd.xlane.f32.xlu0 %v3411_v1  ;;  %v3430_v13 = vadd.f32 %v3301_v56, %v252_v9  ;;  %v3498_v59 = vpop.eup %2827 }
 0x126   :  { %v3501_v60 = vpop.eup %2829 }
 0x127   :  { %353 = vadd.xlane.f32.xlu1 %v3419_v6  ;;  %v2421_v15 = vpop.f32.mrb[24].mxu0  ;;  %v414_v43 = vmul.f32 %v3501_v60, %v3501_v60  ;;  %v3510_v62 = vpop.eup %2831  ;;  %2843 = vtanh.f32 %v3430_v13 }
 0x128   :  { %v3442_v20 = vadd.f32 %v2421_v15, %v3301_v56  ;;  %v262_v21 = vpop.f32.mrb[25].mxu0  ;;  %v3513_v40 = vpop.eup %2833  ;;  %v415_v63 = vmul.f32 %v3510_v62, %v3510_v62  ;;  %2845 = vtanh.f32 %v3424_v8 }
 0x129   :  { %447 = vadd.xlane.f32.xlu0 %v407_v12  ;;  %v3447_v24 = vadd.f32 %v3301_v56, %v262_v21  ;;  %v416_v54 = vmul.f32 %v3513_v40, %v3513_v40  ;;  %v3522_v2 = vpop.eup %2835 }
 0x12a   :  { %v3525_v51 = vpop.eup %2837  ;;  %v417_v3 = vmul.f32 %v3522_v2, %v3522_v2 }
 0x12b   :  { %449 = vadd.xlane.f32.xlu1 %v408_v23  ;;  %v2424_v27 = vpop.f32.mrb[26].mxu0  ;;  %v418_v0 = vmul.f32 %v3525_v51, %v3525_v51  ;;  %2847 = vtanh.f32 %v3447_v24 }
 0x12c   :  { %v3462_v35 = vadd.f32 %v2424_v27, %v3301_v56  ;;  %v272_v36 = vpop.f32.mrb[27].mxu0  ;;  %2849 = vtanh.f32 %v3442_v20 }
 0x12d   :  { %355 = vadd.xlane.f32.xlu0 %v3449_v25  ;;  %v3468_v39 = vadd.f32 %v3301_v56, %v272_v36  ;;  %v3534_v5 = vpop.eup %2839 }
 0x12e   :  { %v3537_v61 = vpop.eup %2841  ;;  %v419_v7 = vmul.f32 %v3534_v5, %v3534_v5 }
 0x12f   :  { %357 = vadd.xlane.f32.xlu1 %v3457_v32  ;;  %v2427_v33 = vpop.f32.mrb[28].mxu0  ;;  %v420_v9 = vmul.f32 %v3537_v61, %v3537_v61  ;;  %2851 = vtanh.f32 %v3468_v39 }
 0x130   :  { %v3474_v42 = vadd.f32 %v2427_v33, %v3301_v56  ;;  %v282_v45 = vpop.f32.mrb[29].mxu0  ;;  %2853 = vtanh.f32 %v3462_v35 }
 0x131   :  { %451 = vadd.xlane.f32.xlu0 %v409_v38  ;;  %v3479_v47 = vadd.f32 %v3301_v56, %v282_v45  ;;  %v3546_v10 = vpop.eup %2843 }
 0x132   :  { %v3549_v8 = vpop.eup %2845  ;;  %v421_v12 = vmul.f32 %v3546_v10, %v3546_v10 }
 0x133   :  { %453 = vadd.xlane.f32.xlu1 %v410_v46  ;;  %v2430_v29 = vpop.f32.mrb[30].mxu0  ;;  %v422_v13 = vmul.f32 %v3549_v8, %v3549_v8  ;;  %2855 = vtanh.f32 %v3479_v47 }
 0x134   :  { %v3486_v52 = vadd.f32 %v2430_v29, %v3301_v56  ;;  %v292_v53 = vpop.f32.mrb[31].mxu0  ;;  %2857 = vtanh.f32 %v3474_v42 }
 0x135   :  { %359 = vadd.xlane.f32.xlu0 %v3481_v48  ;;  %v3492_v57 = vadd.f32 %v3301_v56, %v292_v53  ;;  %v413_v56 = vmul.f32 %v3498_v59, %v3498_v59  ;;  %v3558_v14 = vpop.eup %2847 }
 0x136   :  { %v3561_v15 = vpop.eup %2849  ;;  %v423_v17 = vmul.f32 %v3558_v14, %v3558_v14 }
 0x137   :  { %361 = vadd.xlane.f32.xlu1 %v3483_v50  ;;  %v424_v19 = vmul.f32 %v3561_v15, %v3561_v15  ;;  %2859 = vtanh.f32 %v3492_v57 }
 0x138   :  { %2861 = vtanh.f32 %v3486_v52 }
 0x139   :  { %455 = vadd.xlane.f32.xlu0 %v411_v55  ;;  %v3570_v20 = vpop.eup %2851 }
 0x13a   :  { %v3573_v21 = vpop.eup %2853  ;;  %v425_v22 = vmul.f32 %v3570_v20, %v3570_v20 }
 0x13b   :  { %457 = vadd.xlane.f32.xlu1 %v412_v58  ;;  %v426_v23 = vmul.f32 %v3573_v21, %v3573_v21 }
 0x13d   :  { %363 = vadd.xlane.f32.xlu0 %v3498_v59  ;;  %v3582_v24 = vpop.eup %2855 }
 0x13e   :  { %v3585_v27 = vpop.eup %2857  ;;  %v427_v28 = vmul.f32 %v3582_v24, %v3582_v24 }
 0x13f   :  { %365 = vadd.xlane.f32.xlu1 %v3501_v60  ;;  %v428_v30 = vmul.f32 %v3585_v27, %v3585_v27 }
 0x141   :  { %459 = vadd.xlane.f32.xlu0 %v413_v56  ;;  %v3593_v34 = vpop.eup %2859 }
 0x142   :  { %v3595_v35 = vpop.eup %2861  ;;  %v429_v36 = vmul.f32 %v3593_v34, %v3593_v34 }
 0x143   :  { %461 = vadd.xlane.f32.xlu1 %v414_v43  ;;  %v430_v37 = vmul.f32 %v3595_v35, %v3595_v35 }
 0x145   :  { %367 = vadd.xlane.f32.xlu0 %v3510_v62 }
 0x147   :  { %369 = vadd.xlane.f32.xlu1 %v3513_v40 }
 0x149   :  { %463 = vadd.xlane.f32.xlu0 %v415_v63 }
 0x14b   :  { %465 = vadd.xlane.f32.xlu1 %v416_v54 }
 0x14d   :  { %371 = vadd.xlane.f32.xlu0 %v3522_v2 }
 0x14f   :  { %373 = vadd.xlane.f32.xlu1 %v3525_v51 }
 0x151   :  { %467 = vadd.xlane.f32.xlu0 %v417_v3 }
 0x153   :  { %469 = vadd.xlane.f32.xlu1 %v418_v0 }
 0x155   :  { %375 = vadd.xlane.f32.xlu0 %v3534_v5 }
 0x157   :  { %377 = vadd.xlane.f32.xlu1 %v3537_v61 }
 0x159   :  { %471 = vadd.xlane.f32.xlu0 %v419_v7 }
 0x15b   :  { %473 = vadd.xlane.f32.xlu1 %v420_v9 }
 0x15d   :  { %379 = vadd.xlane.f32.xlu0 %v3546_v10 }
 0x15f   :  { %381 = vadd.xlane.f32.xlu1 %v3549_v8 }
 0x161   :  { %475 = vadd.xlane.f32.xlu0 %v421_v12 }
 0x163   :  { %477 = vadd.xlane.f32.xlu1 %v422_v13 }
 0x165   :  { %383 = vadd.xlane.f32.xlu0 %v3558_v14 }
 0x167   :  { %385 = vadd.xlane.f32.xlu1 %v3561_v15 }
 0x169   :  { %479 = vadd.xlane.f32.xlu0 %v423_v17 }
 0x16b   :  { %481 = vadd.xlane.f32.xlu1 %v424_v19 }
 0x16d   :  { %387 = vadd.xlane.f32.xlu0 %v3570_v20 }
 0x16f   :  { %389 = vadd.xlane.f32.xlu1 %v3573_v21 }
 0x171   :  { %483 = vadd.xlane.f32.xlu0 %v425_v22 }
 0x173   :  { %485 = vadd.xlane.f32.xlu1 %v426_v23 }
 0x175   :  { %391 = vadd.xlane.f32.xlu0 %v3582_v24 }
 0x177   :  { %393 = vadd.xlane.f32.xlu1 %v3585_v27 }
 0x179   :  { %487 = vadd.xlane.f32.xlu0 %v427_v28 }
 0x17b   :  { %489 = vadd.xlane.f32.xlu1 %v428_v30 }
 0x17d   :  { %395 = vadd.xlane.f32.xlu0 %v3593_v34 }
 0x17f   :  { %397 = vadd.xlane.f32.xlu1 %v3595_v35 }
 0x181   :  { %491 = vadd.xlane.f32.xlu0 %v429_v36 }
 0x183   :  { %493 = vadd.xlane.f32.xlu1 %v430_v37 }
 0x192   :  { %v338_v38 = vpop.xlane.xlu0 %337 }
 0x193   :  { %v496_v39 = vmul.f32 0.03125, %v338_v38 }
 0x194   :  { %v434_v41 = vpop.xlane.xlu1 %433 }
 0x195   :  { %v560_v33 = vmul.f32 %v496_v39, %v496_v39  ;;  %v528_v42 = vmul.f32 0.03125, %v434_v41  ;;  %v624_v37 = vsub.f32 %v3307_v4, %v496_v39 }
 0x196   :  { %v336_v45 = vpop.xlane.xlu0 %335 }
 0x197   :  { %v592_v46 = vsub.f32 %v528_v42, %v560_v33  ;;  %v495_v47 = vmul.f32 0.03125, %v336_v45 }
 0x198   :  { %v432_v29 = vpop.xlane.xlu1 %431 }
 0x199   :  { %v656_v52 = vadd.f32 1e-05, %v592_v46  ;;  %v559_v53 = vmul.f32 %v495_v47, %v495_v47  ;;  %v527_v55 = vmul.f32 0.03125, %v432_v29  ;;  %v623_v29 = vsub.f32 %v3319_v11, %v495_v47 }
 0x19a   :  { %v340_v57 = vpop.xlane.xlu0 %339 }
 0x19b   :  { %2863 = vrsqrt.f32 %v656_v52  ;;  %v591_v58 = vsub.f32 %v527_v55, %v559_v53  ;;  %v497_v56 = vmul.f32 0.03125, %v340_v57  ;;  %v3614_v53 = vld [vmem:[%s4545_s1 + $0x1] ss:$0 sm:$0xff] }
 0x19c   :  { %v342_v43 = vpop.xlane.xlu1 %341 }
 0x19d   :  { %v655_v63 = vadd.f32 1e-05, %v591_v58  ;;  %v561_v54 = vmul.f32 %v497_v56, %v497_v56  ;;  %v498_v3 = vmul.f32 0.03125, %v342_v43 }
 0x19e   :  { %v436_v0 = vpop.xlane.xlu0 %435 }
 0x19f   :  { %2865 = vrsqrt.f32 %v655_v63  ;;  %v529_v7 = vmul.f32 0.03125, %v436_v0  ;;  %v562_v12 = vmul.f32 %v498_v3, %v498_v3 }
 0x1a0   :  { %v438_v9 = vpop.xlane.xlu1 %437 }
 0x1a1   :  { %v593_v13 = vsub.f32 %v529_v7, %v561_v54  ;;  %v530_v17 = vmul.f32 0.03125, %v438_v9  ;;  %v3624_v7 = vld [vmem:[%s4545_s1 + $0x2] ss:$0 sm:$0xff] }
 0x1a2   :  { %v344_v19 = vpop.xlane.xlu0 %343 }
 0x1a3   :  { %v657_v22 = vadd.f32 1e-05, %v593_v13  ;;  %v594_v23 = vsub.f32 %v530_v17, %v562_v12  ;;  %v3603_v28 = vmul.f32 0.03125, %v344_v19  ;;  %v625_v17 = vsub.f32 %v3325_v16, %v497_v56 }
 0x1a4   :  { %v346_v30 = vpop.xlane.xlu1 %345 }
 0x1a5   :  { %v2864_v36 = vpop.eup %2863  ;;  %2867 = vrsqrt.f32 %v657_v22  ;;  %v658_v38 = vadd.f32 1e-05, %v594_v23  ;;  %v563_v41 = vmul.f32 %v3603_v28, %v3603_v28  ;;  %v3608_v33 = vmul.f32 0.03125, %v346_v30 }
 0x1a6   :  { %v440_v42 = vpop.xlane.xlu0 %439  ;;  %v720_v46 = vmul.f32 %v2864_v36, %v624_v37 }
 0x1a7   :  { %2869 = vrsqrt.f32 %v658_v38  ;;  %v531_v45 = vmul.f32 0.03125, %v440_v42  ;;  %v564_v39 = vmul.f32 %v3608_v33, %v3608_v33  ;;  %v626_v38 = vsub.f32 %v3327_v18, %v498_v3 }
 0x1a8   :  { %v442_v52 = vpop.xlane.xlu1 %441  ;;  %v756_v11 = vmul.f32 %v3614_v53, %v720_v46 }
 0x1a9   :  { %v2866_v4 = vpop.eup %2865  ;;  %v595_v55 = vsub.f32 %v531_v45, %v563_v41  ;;  %v532_v57 = vmul.f32 0.03125, %v442_v52 }
 0x1aa   :  { %v348_v58 = vpop.xlane.xlu0 %347  ;;  %v719_v43 = vmul.f32 %v2866_v4, %v623_v29  ;;  %v792_v37 = vadd.f32 %v3624_v7, %v756_v11 }
 0x1ab   :  { %v659_v63 = vadd.f32 1e-05, %v595_v55  ;;  %v596_v54 = vsub.f32 %v532_v57, %v564_v39  ;;  %v3618_v0 = vmul.f32 0.03125, %v348_v58 }
 0x1ac   :  { %v350_v47 = vpop.xlane.xlu1 %349  ;;  %v755_v9 = vmul.f32 %v3614_v53, %v719_v43 }
 0x1ad   :  { %2871 = vrsqrt.f32 %v659_v63  ;;  %v660_v12 = vadd.f32 1e-05, %v596_v54  ;;  %v565_v13 = vmul.f32 %v3618_v0, %v3618_v0  ;;  %v3630_v19 = vmul.f32 0.03125, %v350_v47 }
 0x1ae   :  { %v444_v22 = vpop.xlane.xlu0 %443  ;;  %v791_v23 = vadd.f32 %v3624_v7, %v755_v9  ;;  %v627_v54 = vsub.f32 %v3341_v26, %v3603_v28 }
 0x1af   :  { %v2868_v30 = vpop.eup %2867  ;;  %2873 = vrsqrt.f32 %v660_v12  ;;  %v533_v36 = vmul.f32 0.03125, %v444_v22  ;;  %v566_v46 = vmul.f32 %v3630_v19, %v3630_v19 }
 0x1b0   :  { %2463 = vmatprep.mubr.f32.mxu1 %v791_v23  ;;  %v446_v41 = vpop.xlane.xlu1 %445  ;;  %v721_v42 = vmul.f32 %v2868_v30, %v625_v17  ;;  %v628_v17 = vsub.f32 %v3351_v31, %v3608_v33 }
 0x1b1   :  { %v2870_v45 = vpop.eup %2869  ;;  %v597_v16 = vsub.f32 %v533_v36, %v565_v13  ;;  %v534_v56 = vmul.f32 0.03125, %v446_v41  ;;  %2464 = vmatmul.mubr.f32.vlgmr.msra.gmra.mrb[0].mxu1 %v792_v37 }
 0x1b2   :  { %v352_v29 = vpop.xlane.xlu0 %351  ;;  %v757_v52 = vmul.f32 %v3614_v53, %v721_v42  ;;  %v722_v4 = vmul.f32 %v2870_v45, %v626_v38 }
 0x1b3   :  { %v661_v39 = vadd.f32 1e-05, %v597_v16  ;;  %v598_v55 = vsub.f32 %v534_v56, %v566_v46  ;;  %v3638_v57 = vmul.f32 0.03125, %v352_v29 }
 0x1b4   :  { %v354_v58 = vpop.xlane.xlu1 %353  ;;  %v793_v18 = vadd.f32 %v3624_v7, %v757_v52  ;;  %v758_v3 = vmul.f32 %v3614_v53, %v722_v4  ;;  %v629_v52 = vsub.f32 %v3375_v44, %v3618_v0 }
 0x1b5   :  { %2875 = vrsqrt.f32 %v661_v39  ;;  %v662_v43 = vadd.f32 1e-05, %v598_v55  ;;  %v567_v63 = vmul.f32 %v3638_v57, %v3638_v57  ;;  %v3646_v11 = vmul.f32 0.03125, %v354_v58 }
 0x1b6   :  { %v448_v47 = vpop.xlane.xlu0 %447  ;;  %2466 = vmatprep.mubr.f32.mxu1 %v793_v18  ;;  %v794_v9 = vadd.f32 %v3624_v7, %v758_v3  ;;  %v630_v3 = vsub.f32 %v3383_v49, %v3630_v19 }
 0x1b7   :  { %v2872_v12 = vpop.eup %2871  ;;  %2877 = vrsqrt.f32 %v662_v43  ;;  %v535_v13 = vmul.f32 0.03125, %v448_v47  ;;  %v568_v36 = vmul.f32 %v3646_v11, %v3646_v11 }
 0x1b8   :  { %2467 = vmatmul.mubr.f32.gmra.mrb[2].mxu1 %v794_v9  ;;  %v450_v22 = vpop.xlane.xlu1 %449  ;;  %v723_v23 = vmul.f32 %v2872_v12, %v627_v54 }
 0x1b9   :  { %v2874_v30 = vpop.eup %2873  ;;  %v599_v26 = vsub.f32 %v535_v13, %v567_v63  ;;  %v536_v28 = vmul.f32 0.03125, %v450_v22 }
 0x1ba   :  { %v356_v37 = vpop.xlane.xlu0 %355  ;;  %v759_v38 = vmul.f32 %v3614_v53, %v723_v23  ;;  %v724_v41 = vmul.f32 %v2874_v30, %v628_v17 }
 0x1bb   :  { %v663_v42 = vadd.f32 1e-05, %v599_v26  ;;  %v600_v45 = vsub.f32 %v536_v28, %v568_v36  ;;  %v3654_v46 = vmul.f32 0.03125, %v356_v37  ;;  %v631_v28 = vsub.f32 %v3411_v1, %v3638_v57 }
 0x1bc   :  { %v358_v16 = vpop.xlane.xlu1 %357  ;;  %v795_v31 = vadd.f32 %v3624_v7, %v759_v38  ;;  %v760_v33 = vmul.f32 %v3614_v53, %v724_v41 }
 0x1bd   :  { %2879 = vrsqrt.f32 %v663_v42  ;;  %v664_v56 = vadd.f32 1e-05, %v600_v45  ;;  %v569_v29 = vmul.f32 %v3654_v46, %v3654_v46  ;;  %v3662_v4 = vmul.f32 0.03125, %v358_v16 }
 0x1be   :  { %v452_v39 = vpop.xlane.xlu0 %451  ;;  %2469 = vmatprep.mubr.f32.mxu1 %v795_v31  ;;  %v796_v55 = vadd.f32 %v3624_v7, %v760_v33  ;;  %v632_v16 = vsub.f32 %v3419_v6, %v3646_v11 }
 0x1bf   :  { %v2876_v58 = vpop.eup %2875  ;;  %2881 = vrsqrt.f32 %v664_v56  ;;  %v537_v18 = vmul.f32 0.03125, %v452_v39  ;;  %v570_v47 = vmul.f32 %v3662_v4, %v3662_v4 }
 0x1c0   :  { %2470 = vmatmul.mubr.f32.gmra.mrb[4].mxu1 %v796_v55  ;;  %v454_v43 = vpop.xlane.xlu1 %453  ;;  %v725_v63 = vmul.f32 %v2876_v58, %v629_v52 }
 0x1c1   :  { %v2878_v54 = vpop.eup %2877  ;;  %v601_v44 = vsub.f32 %v537_v18, %v569_v29  ;;  %v538_v0 = vmul.f32 0.03125, %v454_v43 }
 0x1c2   :  { %v360_v9 = vpop.xlane.xlu0 %359  ;;  %v761_v12 = vmul.f32 %v3614_v53, %v725_v63  ;;  %v726_v13 = vmul.f32 %v2878_v54, %v630_v3 }
 0x1c3   :  { %v665_v17 = vadd.f32 1e-05, %v601_v44  ;;  %v602_v22 = vsub.f32 %v538_v0, %v570_v47  ;;  %v3670_v23 = vmul.f32 0.03125, %v360_v9  ;;  %v633_v47 = vsub.f32 %v3449_v25, %v3654_v46 }
 0x1c4   :  { %v362_v30 = vpop.xlane.xlu1 %361  ;;  %v797_v49 = vadd.f32 %v3624_v7, %v761_v12  ;;  %v762_v19 = vmul.f32 %v3614_v53, %v726_v13 }
 0x1c5   :  { %2883 = vrsqrt.f32 %v665_v17  ;;  %v666_v36 = vadd.f32 1e-05, %v602_v22  ;;  %v571_v26 = vmul.f32 %v3670_v23, %v3670_v23  ;;  %v3678_v37 = vmul.f32 0.03125, %v362_v30 }
 0x1c6   :  { %v456_v38 = vpop.xlane.xlu0 %455  ;;  %2472 = vmatprep.mubr.f32.mxu1 %v797_v49  ;;  %v798_v41 = vadd.f32 %v3624_v7, %v762_v19  ;;  %v634_v17 = vsub.f32 %v3457_v32, %v3662_v4 }
 0x1c7   :  { %v2880_v42 = vpop.eup %2879  ;;  %2885 = vrsqrt.f32 %v666_v36  ;;  %v539_v45 = vmul.f32 0.03125, %v456_v38  ;;  %v572_v29 = vmul.f32 %v3678_v37, %v3678_v37 }
 0x1c8   :  { %2473 = vmatmul.mubr.f32.gmra.mrb[6].mxu1 %v798_v41  ;;  %v458_v31 = vpop.xlane.xlu1 %457  ;;  %v727_v33 = vmul.f32 %v2880_v42, %v631_v28 }
 0x1c9   :  { %v2882_v56 = vpop.eup %2881  ;;  %v603_v1 = vsub.f32 %v539_v45, %v571_v26  ;;  %v540_v57 = vmul.f32 0.03125, %v458_v31 }
 0x1ca   :  { %v364_v52 = vpop.xlane.xlu0 %363  ;;  %v763_v39 = vmul.f32 %v3614_v53, %v727_v33  ;;  %v728_v55 = vmul.f32 %v2882_v56, %v632_v16  ;;  %v635_v33 = vsub.f32 %v3481_v48, %v3670_v23 }
 0x1cb   :  { %v667_v58 = vadd.f32 1e-05, %v603_v1  ;;  %v604_v18 = vsub.f32 %v540_v57, %v572_v29  ;;  %v3686_v3 = vmul.f32 0.03125, %v364_v52 }
 0x1cc   :  { %v366_v43 = vpop.xlane.xlu1 %365  ;;  %v799_v6 = vadd.f32 %v3624_v7, %v763_v39  ;;  %v764_v11 = vmul.f32 %v3614_v53, %v728_v55  ;;  %v636_v39 = vsub.f32 %v3483_v50, %v3678_v37 }
 0x1cd   :  { %2887 = vrsqrt.f32 %v667_v58  ;;  %v668_v63 = vadd.f32 1e-05, %v604_v18  ;;  %v573_v54 = vmul.f32 %v3686_v3, %v3686_v3  ;;  %v3694_v44 = vmul.f32 0.03125, %v366_v43 }
 0x1ce   :  { %v460_v0 = vpop.xlane.xlu0 %459  ;;  %2475 = vmatprep.mubr.f32.mxu1 %v799_v6  ;;  %v800_v9 = vadd.f32 %v3624_v7, %v764_v11 }
 0x1cf   :  { %v2884_v12 = vpop.eup %2883  ;;  %2889 = vrsqrt.f32 %v668_v63  ;;  %v541_v13 = vmul.f32 0.03125, %v460_v0  ;;  %v574_v19 = vmul.f32 %v3694_v44, %v3694_v44 }
 0x1d0   :  { %2476 = vmatmul.mubr.f32.gmra.mrb[8].mxu1 %v800_v9  ;;  %v462_v22 = vpop.xlane.xlu1 %461  ;;  %v729_v30 = vmul.f32 %v2884_v12, %v633_v47 }
 0x1d1   :  { %v2886_v49 = vpop.eup %2885  ;;  %v605_v25 = vsub.f32 %v541_v13, %v573_v54  ;;  %v542_v46 = vmul.f32 0.03125, %v462_v22 }
 0x1d2   :  { %v368_v36 = vpop.xlane.xlu0 %367  ;;  %v765_v26 = vmul.f32 %v3614_v53, %v729_v30  ;;  %v730_v28 = vmul.f32 %v2886_v49, %v634_v17  ;;  %v637_v17 = vsub.f32 %v3498_v59, %v3686_v3 }
 0x1d3   :  { %v669_v38 = vadd.f32 1e-05, %v605_v25  ;;  %v606_v41 = vsub.f32 %v542_v46, %v574_v19  ;;  %v3702_v42 = vmul.f32 0.03125, %v368_v36  ;;  %v638_v46 = vsub.f32 %v3501_v60, %v3694_v44 }
 0x1d4   :  { %v370_v45 = vpop.xlane.xlu1 %369  ;;  %v801_v32 = vadd.f32 %v3624_v7, %v765_v26  ;;  %v766_v4 = vmul.f32 %v3614_v53, %v730_v28 }
 0x1d5   :  { %2891 = vrsqrt.f32 %v669_v38  ;;  %v670_v16 = vadd.f32 1e-05, %v606_v41  ;;  %v575_v31 = vmul.f32 %v3702_v42, %v3702_v42  ;;  %v3710_v56 = vmul.f32 0.03125, %v370_v45 }
 0x1d6   :  { %v464_v29 = vpop.xlane.xlu0 %463  ;;  %2478 = vmatprep.mubr.f32.mxu1 %v801_v32  ;;  %v802_v1 = vadd.f32 %v3624_v7, %v766_v4 }
 0x1d7   :  { %v2888_v57 = vpop.eup %2887  ;;  %2893 = vrsqrt.f32 %v670_v16  ;;  %v543_v52 = vmul.f32 0.03125, %v464_v29  ;;  %v576_v43 = vmul.f32 %v3710_v56, %v3710_v56 }
 0x1d8   :  { %2479 = vmatmul.mubr.f32.gmra.mrb[10].mxu1 %v802_v1  ;;  %v466_v55 = vpop.xlane.xlu1 %465  ;;  %v731_v58 = vmul.f32 %v2888_v57, %v635_v33  ;;  %v639_v57 = vsub.f32 %v3510_v62, %v3702_v42 }
 0x1d9   :  { %v2890_v18 = vpop.eup %2889  ;;  %v607_v48 = vsub.f32 %v543_v52, %v575_v31  ;;  %v544_v23 = vmul.f32 0.03125, %v466_v55 }
 0x1da   :  { %v372_v6 = vpop.xlane.xlu0 %371  ;;  %v767_v11 = vmul.f32 %v3614_v53, %v731_v58  ;;  %v732_v63 = vmul.f32 %v2890_v18, %v636_v39 }
 0x1db   :  { %v671_v54 = vadd.f32 1e-05, %v607_v48  ;;  %v608_v47 = vsub.f32 %v544_v23, %v576_v43  ;;  %v3718_v0 = vmul.f32 0.03125, %v372_v6  ;;  %v640_v43 = vsub.f32 %v3513_v40, %v3710_v56 }
 0x1dc   :  { %v374_v9 = vpop.xlane.xlu1 %373  ;;  %v803_v50 = vadd.f32 %v3624_v7, %v767_v11  ;;  %v768_v37 = vmul.f32 %v3614_v53, %v732_v63 }
 0x1dd   :  { %2895 = vrsqrt.f32 %v671_v54  ;;  %v672_v12 = vadd.f32 1e-05, %v608_v47  ;;  %v577_v13 = vmul.f32 %v3718_v0, %v3718_v0  ;;  %v3726_v22 = vmul.f32 0.03125, %v374_v9 }
 0x1de   :  { %v468_v30 = vpop.xlane.xlu0 %467  ;;  %2481 = vmatprep.mubr.f32.mxu1 %v803_v50  ;;  %v804_v49 = vadd.f32 %v3624_v7, %v768_v37 }
 0x1df   :  { %v2892_v19 = vpop.eup %2891  ;;  %2897 = vrsqrt.f32 %v672_v12  ;;  %v545_v25 = vmul.f32 0.03125, %v468_v30  ;;  %v578_v38 = vmul.f32 %v3726_v22, %v3726_v22  ;;  %v641_v30 = vsub.f32 %v3522_v2, %v3718_v0 }
 0x1e0   :  { %2482 = vmatmul.mubr.f32.gmra.mrb[12].mxu1 %v804_v49  ;;  %v470_v36 = vpop.xlane.xlu1 %469  ;;  %v733_v26 = vmul.f32 %v2892_v19, %v637_v17 }
 0x1e1   :  { %v2894_v28 = vpop.eup %2893  ;;  %v609_v59 = vsub.f32 %v545_v25, %v577_v13  ;;  %v546_v3 = vmul.f32 0.03125, %v470_v36 }
 0x1e2   :  { %v376_v41 = vpop.xlane.xlu0 %375  ;;  %v769_v45 = vmul.f32 %v3614_v53, %v733_v26  ;;  %v734_v32 = vmul.f32 %v2894_v28, %v638_v46  ;;  %v642_v26 = vsub.f32 %v3525_v51, %v3726_v22 }
 0x1e3   :  { %v673_v4 = vadd.f32 1e-05, %v609_v59  ;;  %v610_v16 = vsub.f32 %v546_v3, %v578_v38  ;;  %v3734_v31 = vmul.f32 0.03125, %v376_v41 }
 0x1e4   :  { %v378_v33 = vpop.xlane.xlu1 %377  ;;  %v805_v60 = vadd.f32 %v3624_v7, %v769_v45  ;;  %v770_v44 = vmul.f32 %v3614_v53, %v734_v32 }
 0x1e5   :  { %2899 = vrsqrt.f32 %v673_v4  ;;  %v674_v29 = vadd.f32 1e-05, %v610_v16  ;;  %v579_v1 = vmul.f32 %v3734_v31, %v3734_v31  ;;  %v3742_v52 = vmul.f32 0.03125, %v378_v33 }
 0x1e6   :  { %v472_v39 = vpop.xlane.xlu0 %471  ;;  %2484 = vmatprep.mubr.f32.mxu1 %v805_v60  ;;  %v806_v55 = vadd.f32 %v3624_v7, %v770_v44 }
 0x1e7   :  { %v2896_v58 = vpop.eup %2895  ;;  %2901 = vrsqrt.f32 %v674_v29  ;;  %v547_v18 = vmul.f32 0.03125, %v472_v39  ;;  %v580_v11 = vmul.f32 %v3742_v52, %v3742_v52 }
 0x1e8   :  { %2485 = vmatmul.mubr.f32.gmra.mrb[14].mxu1 %v806_v55  ;;  %v474_v48 = vpop.xlane.xlu1 %473  ;;  %v735_v23 = vmul.f32 %v2896_v58, %v639_v57 }
 0x1e9   :  { %v2898_v6 = vpop.eup %2897  ;;  %v611_v62 = vsub.f32 %v547_v18, %v579_v1  ;;  %v548_v42 = vmul.f32 0.03125, %v474_v48  ;;  %v643_v1 = vsub.f32 %v3534_v5, %v3734_v31 }
 0x1ea   :  { %v380_v63 = vpop.xlane.xlu0 %379  ;;  %v771_v54 = vmul.f32 %v3614_v53, %v735_v23  ;;  %v736_v47 = vmul.f32 %v2898_v6, %v640_v43  ;;  %v644_v43 = vsub.f32 %v3537_v61, %v3742_v52 }
 0x1eb   :  { %v675_v9 = vadd.f32 1e-05, %v611_v62  ;;  %v612_v50 = vsub.f32 %v548_v42, %v580_v11  ;;  %v3750_v37 = vmul.f32 0.03125, %v380_v63 }
 0x1ec   :  { %v382_v12 = vpop.xlane.xlu1 %381  ;;  %v807_v40 = vadd.f32 %v3624_v7, %v771_v54  ;;  %v772_v56 = vmul.f32 %v3614_v53, %v736_v47 }
 0x1ed   :  { %2903 = vrsqrt.f32 %v675_v9  ;;  %v676_v13 = vadd.f32 1e-05, %v612_v50  ;;  %v581_v17 = vmul.f32 %v3750_v37, %v3750_v37  ;;  %v3758_v49 = vmul.f32 0.03125, %v382_v12 }
 0x1ee   :  { %v476_v19 = vpop.xlane.xlu0 %475  ;;  %2487 = vmatprep.mubr.f32.mxu1 %v807_v40  ;;  %v808_v25 = vadd.f32 %v3624_v7, %v772_v56  ;;  %v645_v56 = vsub.f32 %v3546_v10, %v3750_v37 }
 0x1ef   :  { %v2900_v46 = vpop.eup %2899  ;;  %2905 = vrsqrt.f32 %v676_v13  ;;  %v549_v36 = vmul.f32 0.03125, %v476_v19  ;;  %v582_v3 = vmul.f32 %v3758_v49, %v3758_v49 }
 0x1f0   :  { %2488 = vmatmul.mubr.f32.gmra.mrb[16].mxu1 %v808_v25  ;;  %v478_v28 = vpop.xlane.xlu1 %477  ;;  %v737_v38 = vmul.f32 %v2900_v46, %v641_v30  ;;  %v646_v46 = vsub.f32 %v3549_v8, %v3758_v49 }
 0x1f1   :  { %v2902_v59 = vpop.eup %2901  ;;  %v613_v2 = vsub.f32 %v549_v36, %v581_v17  ;;  %v550_v0 = vmul.f32 0.03125, %v478_v28 }
 0x1f2   :  { %v384_v41 = vpop.xlane.xlu0 %383  ;;  %v773_v45 = vmul.f32 %v3614_v53, %v737_v38  ;;  %v738_v32 = vmul.f32 %v2902_v59, %v642_v26 }
 0x1f3   :  { %v677_v4 = vadd.f32 1e-05, %v613_v2  ;;  %v614_v16 = vsub.f32 %v550_v0, %v582_v3  ;;  %v3766_v33 = vmul.f32 0.03125, %v384_v41 }
 0x1f4   :  { %v386_v60 = vpop.xlane.xlu1 %385  ;;  %v809_v51 = vadd.f32 %v3624_v7, %v773_v45  ;;  %v774_v22 = vmul.f32 %v3614_v53, %v738_v32 }
 0x1f5   :  { %2907 = vrsqrt.f32 %v677_v4  ;;  %v678_v44 = vadd.f32 1e-05, %v614_v16  ;;  %v583_v29 = vmul.f32 %v3766_v33, %v3766_v33  ;;  %v3774_v57 = vmul.f32 0.03125, %v386_v60 }
 0x1f6   :  { %v480_v39 = vpop.xlane.xlu0 %479  ;;  %2490 = vmatprep.mubr.f32.mxu1 %v809_v51  ;;  %v810_v55 = vadd.f32 %v3624_v7, %v774_v22  ;;  %v647_v60 = vsub.f32 %v3558_v14, %v3766_v33 }
 0x1f7   :  { %v2904_v58 = vpop.eup %2903  ;;  %2909 = vrsqrt.f32 %v678_v44  ;;  %v551_v18 = vmul.f32 0.03125, %v480_v39  ;;  %v584_v11 = vmul.f32 %v3774_v57, %v3774_v57  ;;  %v648_v39 = vsub.f32 %v3561_v15, %v3774_v57 }
 0x1f8   :  { %2491 = vmatmul.mubr.f32.gmra.mrb[18].mxu1 %v810_v55  ;;  %v482_v48 = vpop.xlane.xlu1 %481  ;;  %v739_v23 = vmul.f32 %v2904_v58, %v643_v1 }
 0x1f9   :  { %v2906_v6 = vpop.eup %2905  ;;  %v615_v5 = vsub.f32 %v551_v18, %v583_v29  ;;  %v552_v31 = vmul.f32 0.03125, %v482_v48 }
 0x1fa   :  { %v388_v62 = vpop.xlane.xlu0 %387  ;;  %v775_v42 = vmul.f32 %v3614_v53, %v739_v23  ;;  %v740_v63 = vmul.f32 %v2906_v6, %v644_v43 }
 0x1fb   :  { %v679_v54 = vadd.f32 1e-05, %v615_v5  ;;  %v616_v47 = vsub.f32 %v552_v31, %v584_v11  ;;  %v3782_v9 = vmul.f32 0.03125, %v388_v62 }
 0x1fc   :  { %v390_v50 = vpop.xlane.xlu1 %389  ;;  %v811_v61 = vadd.f32 %v3624_v7, %v775_v42  ;;  %v776_v52 = vmul.f32 %v3614_v53, %v740_v63 }
 0x1fd   :  { %2911 = vrsqrt.f32 %v679_v54  ;;  %v680_v12 = vadd.f32 1e-05, %v616_v47  ;;  %v585_v40 = vmul.f32 %v3782_v9, %v3782_v9  ;;  %v3790_v13 = vmul.f32 0.03125, %v390_v50 }
 0x1fe   :  { %v484_v17 = vpop.xlane.xlu0 %483  ;;  %2493 = vmatprep.mubr.f32.mxu1 %v811_v61  ;;  %v812_v30 = vadd.f32 %v3624_v7, %v776_v52  ;;  %v649_v54 = vsub.f32 %v3570_v20, %v3782_v9 }
 0x1ff   :  { %v2908_v19 = vpop.eup %2907  ;;  %2913 = vrsqrt.f32 %v680_v12  ;;  %v553_v25 = vmul.f32 0.03125, %v484_v17  ;;  %v586_v38 = vmul.f32 %v3790_v13, %v3790_v13 }
 0x200   :  { %2494 = vmatmul.mubr.f32.gmra.mrb[20].mxu1 %v812_v30  ;;  %v486_v36 = vpop.xlane.xlu1 %485  ;;  %v741_v26 = vmul.f32 %v2908_v19, %v645_v56 }
 0x201   :  { %v2910_v28 = vpop.eup %2909  ;;  %v617_v10 = vsub.f32 %v553_v25, %v585_v40  ;;  %v554_v37 = vmul.f32 0.03125, %v486_v36  ;;  %v650_v40 = vsub.f32 %v3573_v21, %v3790_v13 }
 0x202   :  { %v392_v59 = vpop.xlane.xlu0 %391  ;;  %v777_v3 = vmul.f32 %v3614_v53, %v741_v26  ;;  %v742_v2 = vmul.f32 %v2910_v28, %v646_v46 }
 0x203   :  { %v681_v0 = vadd.f32 1e-05, %v617_v10  ;;  %v618_v41 = vsub.f32 %v554_v37, %v586_v38  ;;  %v3798_v45 = vmul.f32 0.03125, %v392_v59 }
 0x204   :  { %v394_v32 = vpop.xlane.xlu1 %393  ;;  %v813_v8 = vadd.f32 %v3624_v7, %v777_v3  ;;  %v778_v49 = vmul.f32 %v3614_v53, %v742_v2 }
 0x205   :  { %2915 = vrsqrt.f32 %v681_v0  ;;  %v682_v4 = vadd.f32 1e-05, %v618_v41  ;;  %v587_v16 = vmul.f32 %v3798_v45, %v3798_v45  ;;  %v524_v51 = vmul.f32 0.03125, %v394_v32 }
 0x206   :  { %v488_v22 = vpop.xlane.xlu0 %487  ;;  %2496 = vmatprep.mubr.f32.mxu1 %v813_v8  ;;  %v814_v44 = vadd.f32 %v3624_v7, %v778_v49  ;;  %v651_v21 = vsub.f32 %v3582_v24, %v3798_v45 }
 0x207   :  { %v2912_v29 = vpop.eup %2911  ;;  %2917 = vrsqrt.f32 %v682_v4  ;;  %v555_v1 = vmul.f32 0.03125, %v488_v22  ;;  %v588_v43 = vmul.f32 %v524_v51, %v524_v51  ;;  %v652_v59 = vsub.f32 %v3585_v27, %v524_v51 }
 0x208   :  { %2497 = vmatmul.mubr.f32.gmra.mrb[22].mxu1 %v814_v44  ;;  %v490_v55 = vpop.xlane.xlu1 %489  ;;  %v743_v58 = vmul.f32 %v2912_v29, %v647_v60 }
 0x209   :  { %v2914_v18 = vpop.eup %2913  ;;  %v619_v48 = vsub.f32 %v555_v1, %v587_v16  ;;  %v556_v23 = vmul.f32 0.03125, %v490_v55 }
 0x20a   :  { %v396_v6 = vpop.xlane.xlu0 %395  ;;  %v779_v14 = vmul.f32 %v3614_v53, %v743_v58  ;;  %v744_v33 = vmul.f32 %v2914_v18, %v648_v39 }
 0x20b   :  { %v683_v11 = vadd.f32 1e-05, %v619_v48  ;;  %v620_v5 = vsub.f32 %v556_v23, %v588_v43  ;;  %v525_v31 = vmul.f32 0.03125, %v396_v6  ;;  %v1591_v43 = vld [vmem:[%s4547_s4] sm:$0xff]  ;;  %v1592_v48 = vld [vmem:[%s4547_s4 + $0x8] sm:$0xff] }
 0x20c   :  { %v398_v62 = vpop.xlane.xlu1 %397  ;;  %v815_v42 = vadd.f32 %v3624_v7, %v779_v14  ;;  %v780_v63 = vmul.f32 %v3614_v53, %v744_v33  ;;  %v2735_v6 = vpack.c.bf16 %v1592_v48, %v1591_v43 }
 0x20d   :  { %2919 = vrsqrt.f32 %v683_v11  ;;  %v684_v15 = vadd.f32 1e-05, %v620_v5  ;;  %v589_v57 = vmul.f32 %v525_v31, %v525_v31  ;;  %v526_v47 = vmul.f32 0.03125, %v398_v62 }
 0x20e   :  { %v492_v50 = vpop.xlane.xlu0 %491  ;;  %2499 = vmatprep.mubr.f32.mxu1 %v815_v42  ;;  %v816_v61 = vadd.f32 %v3624_v7, %v780_v63  ;;  %v653_v49 = vsub.f32 %v3593_v34, %v525_v31  ;;  %v3837_v34 = vld [vmem:[%s4545_s1 + $0x3] ss:$0 sm:$0xff]  ;;  %2736 = vmatprep.subr.bf16.mxu0 %v2735_v6 }
 0x20f   :  { %v2916_v52 = vpop.eup %2915  ;;  %2921 = vrsqrt.f32 %v684_v15  ;;  %v557_v12 = vmul.f32 0.03125, %v492_v50  ;;  %v590_v19 = vmul.f32 %v526_v47, %v526_v47  ;;  %v654_v4 = vsub.f32 %v3595_v35, %v526_v47  ;;  %2738 = vmatpush3.bf16.msra.mxu0 %v2735_v6 }
 0x210   :  { %2500 = vmatmul.mubr.f32.gmra.mrb[24].mxu1 %v816_v61  ;;  %v494_v56 = vpop.xlane.xlu1 %493  ;;  %v745_v17 = vmul.f32 %v2916_v52, %v649_v54 }
 0x211   :  { %v2918_v30 = vpop.eup %2917  ;;  %v621_v25 = vsub.f32 %v557_v12, %v589_v57  ;;  %v558_v46 = vmul.f32 0.03125, %v494_v56  ;;  %v1593_v12 = vld [vmem:[%s4547_s4 + $0x10] sm:$0xff] }
 0x212   :  { %v781_v20 = vmul.f32 %v3614_v53, %v745_v17  ;;  %v746_v9 = vmul.f32 %v2918_v30, %v650_v40  ;;  %v1594_v40 = vld [vmem:[%s4547_s4 + $0x18] sm:$0xff] }
 0x213   :  { %v685_v36 = vadd.f32 1e-05, %v621_v25  ;;  %v622_v26 = vsub.f32 %v558_v46, %v590_v19  ;;  %v2739_v17 = vpack.c.bf16 %v1594_v40, %v1593_v12  ;;  %v1595_v25 = vld [vmem:[%s4547_s4 + $0x20] sm:$0xff]  ;;  %v1596_v46 = vld [vmem:[%s4547_s4 + $0x28] sm:$0xff] }
 0x214   :  { %v817_v28 = vadd.f32 %v3624_v7, %v781_v20  ;;  %v782_v38 = vmul.f32 %v3614_v53, %v746_v9 }
 0x215   :  { %2923 = vrsqrt.f32 %v685_v36  ;;  %v686_v10 = vadd.f32 1e-05, %v622_v26  ;;  %2740 = vmatprep.subr.bf16.mxu0 %v2739_v17  ;;  %v2743_v26 = vpack.c.bf16 %v1596_v46, %v1595_v25 }
 0x216   :  { %2502 = vmatprep.mubr.f32.mxu1 %v817_v28  ;;  %v818_v13 = vadd.f32 %v3624_v7, %v782_v38  ;;  %2742 = vmatpush3.bf16.msra.mxu0 %v2739_v17 }
 0x217   :  { %v2920_v37 = vpop.eup %2919  ;;  %2925 = vrsqrt.f32 %v686_v10  ;;  %2744 = vmatprep.subr.bf16.mxu0 %v2743_v26  ;;  %v1597_v10 = vld [vmem:[%s4547_s4 + $0x30] sm:$0xff] }
 0x218   :  { %2503 = vmatmul.mubr.f32.gmra.mrb[26].mxu1 %v818_v13  ;;  %v747_v3 = vmul.f32 %v2920_v37, %v651_v21  ;;  %v1598_v21 = vld [vmem:[%s4547_s4 + $0x38] sm:$0xff] }
 0x219   :  { %v2922_v2 = vpop.eup %2921  ;;  %v2747_v37 = vpack.c.bf16 %v1598_v21, %v1597_v10 }
 0x21a   :  { %v783_v0 = vmul.f32 %v3614_v53, %v747_v3  ;;  %v748_v41 = vmul.f32 %v2922_v2, %v652_v59  ;;  %2746 = vmatpush3.bf16.msra.mxu0 %v2743_v26  ;;  %v1599_v2 = vld [vmem:[%s4547_s4 + $0x40] sm:$0xff] }
 0x21b   :  { %2748 = vmatprep.subr.bf16.mxu0 %v2747_v37 }
 0x21c   :  { %v819_v32 = vadd.f32 %v3624_v7, %v783_v0  ;;  %v784_v8 = vmul.f32 %v3614_v53, %v748_v41  ;;  %v1600_v0 = vld [vmem:[%s4547_s4 + $0x48] sm:$0xff] }
 0x21e   :  { %2505 = vmatprep.mubr.f32.mxu1 %v819_v32  ;;  %v820_v24 = vadd.f32 %v3624_v7, %v784_v8  ;;  %2750 = vmatpush3.bf16.msra.mxu0 %v2747_v37 }
 0x21f   :  { %v2924_v45 = vpop.eup %2923 }
 0x220   :  { %2506 = vmatmul.mubr.f32.gmra.mrb[28].mxu1 %v820_v24  ;;  %v749_v27 = vmul.f32 %v2924_v45, %v653_v49  ;;  %v2751_v49 = vpack.c.bf16 %v1600_v0, %v1599_v2 }
 0x221   :  { %v2926_v16 = vpop.eup %2925 }
 0x222   :  { %v785_v60 = vmul.f32 %v3614_v53, %v749_v27  ;;  %v750_v51 = vmul.f32 %v2926_v16, %v654_v4  ;;  %2752 = vmatprep.subr.bf16.mxu0 %v2751_v49  ;;  %v1601_v4 = vld [vmem:[%s4547_s4 + $0x50] sm:$0xff]  ;;  %v1602_v27 = vld [vmem:[%s4547_s4 + $0x58] sm:$0xff] }
 0x223   :  { %2754 = vmatpush3.bf16.msra.mxu0 %v2751_v49 }
 0x224   :  { %v821_v22 = vadd.f32 %v3624_v7, %v785_v60  ;;  %v786_v44 = vmul.f32 %v3614_v53, %v750_v51  ;;  %v2755_v60 = vpack.c.bf16 %v1602_v27, %v1601_v4 }
 0x226   :  { %2508 = vmatprep.mubr.f32.mxu1 %v821_v22  ;;  %v822_v29 = vadd.f32 %v3624_v7, %v786_v44  ;;  %2756 = vmatprep.subr.bf16.mxu0 %v2755_v60  ;;  %v1603_v44 = vld [vmem:[%s4547_s4 + $0x60] sm:$0xff] }
 0x227   :  { %2758 = vmatpush3.bf16.msra.mxu0 %v2755_v60 }
 0x228   :  { %2509 = vmatmul.mubr.f32.gmra.mrb[30].mxu1 %v822_v29  ;;  %v1604_v29 = vld [vmem:[%s4547_s4 + $0x68] sm:$0xff] }
 0x284   :  { %v2465_v35 = vpop.f32.mrb[0].mxu1 }
 0x285   :  { %v916_v1 = vadd.f32 %v2465_v35, %v3837_v34  ;;  %v910_v39 = vpop.f32.mrb[1].mxu1 }
 0x286   :  { %v911_v55 = vadd.f32 %v3837_v34, %v910_v39 }
 0x287   :  { %2927 = vtanh.f32 %v916_v1 }
 0x288   :  { %2929 = vtanh.f32 %v911_v55  ;;  %v2759_v55 = vpack.c.bf16 %v1604_v29, %v1603_v44 }
 0x28a   :  { %2760 = vmatprep.subr.bf16.mxu0 %v2759_v55 }
 0x28b   :  { %v2468_v58 = vpop.f32.mrb[2].mxu1  ;;  %2762 = vmatpush3.bf16.msra.mxu0 %v2759_v55 }
 0x28c   :  { %v926_v53 = vadd.f32 %v2468_v58, %v3837_v34  ;;  %v920_v18 = vpop.f32.mrb[3].mxu1 }
 0x28d   :  { %v921_v7 = vadd.f32 %v3837_v34, %v920_v18  ;;  %v1605_v18 = vld [vmem:[%s4547_s4 + $0x70] sm:$0xff] }
 0x28e   :  { %2931 = vtanh.f32 %v926_v53 }
 0x28f   :  { %2933 = vtanh.f32 %v921_v7  ;;  %v1606_v7 = vld [vmem:[%s4547_s4 + $0x78] sm:$0xff] }
 0x290   :  { %v2763_v48 = vpack.c.bf16 %v1606_v7, %v1605_v18 }
 0x291   :  { %v3849_v23 = vpop.eup %2927 }
 0x292   :  { %v3851_v14 = vpop.eup %2929  ;;  %1105 = vadd.xlane.f32.xlu1 %v3849_v23  ;;  %v1168_v31 = vmul.f32 %v3849_v23, %v3849_v23  ;;  %2764 = vmatprep.subr.bf16.mxu0 %v2763_v48 }
 0x293   :  { %1103 = vadd.xlane.f32.xlu0 %v3851_v14  ;;  %v2471_v33 = vpop.f32.mrb[4].mxu1  ;;  %v1167_v42 = vmul.f32 %v3851_v14, %v3851_v14  ;;  %2766 = vmatpush3.bf16.msra.mxu0 %v2763_v48 }
 0x294   :  { %v936_v11 = vadd.f32 %v2471_v33, %v3837_v34  ;;  %v930_v5 = vpop.f32.mrb[5].mxu1 }
 0x295   :  { %v931_v62 = vadd.f32 %v3837_v34, %v930_v5 }
 0x296   :  { %2935 = vtanh.f32 %v936_v11  ;;  %1201 = vadd.xlane.f32.xlu1 %v1168_v31 }
 0x297   :  { %2937 = vtanh.f32 %v931_v62  ;;  %1199 = vadd.xlane.f32.xlu0 %v1167_v42 }
 0x298   :  { %v3861_v63 = vpop.eup %2931 }
 0x299   :  { %v3863_v15 = vpop.eup %2933  ;;  %v1170_v50 = vmul.f32 %v3861_v63, %v3861_v63 }
 0x29a   :  { %1109 = vadd.xlane.f32.xlu1 %v3861_v63  ;;  %v1169_v52 = vmul.f32 %v3863_v15, %v3863_v15 }
 0x29b   :  { %1107 = vadd.xlane.f32.xlu0 %v3863_v15  ;;  %v2474_v57 = vpop.f32.mrb[6].mxu1 }
 0x29c   :  { %v946_v54 = vadd.f32 %v2474_v57, %v3837_v34  ;;  %v940_v47 = vpop.f32.mrb[7].mxu1 }
 0x29d   :  { %v941_v61 = vadd.f32 %v3837_v34, %v940_v47 }
 0x29e   :  { %2939 = vtanh.f32 %v946_v54  ;;  %1205 = vadd.xlane.f32.xlu1 %v1170_v50 }
 0x29f   :  { %2941 = vtanh.f32 %v941_v61  ;;  %1203 = vadd.xlane.f32.xlu0 %v1169_v52 }
 0x2a0   :  { %v3879_v56 = vpop.eup %2935 }
 0x2a1   :  { %v3881_v30 = vpop.eup %2937  ;;  %v1172_v36 = vmul.f32 %v3879_v56, %v3879_v56 }
 0x2a2   :  { %1113 = vadd.xlane.f32.xlu1 %v3879_v56  ;;  %v1171_v38 = vmul.f32 %v3881_v30, %v3881_v30 }
 0x2a3   :  { %1111 = vadd.xlane.f32.xlu0 %v3881_v30  ;;  %v2477_v19 = vpop.f32.mrb[8].mxu1 }
 0x2a4   :  { %v956_v20 = vadd.f32 %v2477_v19, %v3837_v34  ;;  %v950_v9 = vpop.f32.mrb[9].mxu1 }
 0x2a5   :  { %v951_v28 = vadd.f32 %v3837_v34, %v950_v9 }
 0x2a6   :  { %2943 = vtanh.f32 %v956_v20  ;;  %1209 = vadd.xlane.f32.xlu1 %v1172_v36 }
 0x2a7   :  { %2945 = vtanh.f32 %v951_v28  ;;  %1207 = vadd.xlane.f32.xlu0 %v1171_v38 }
 0x2a8   :  { %v3903_v13 = vpop.eup %2939 }
 0x2a9   :  { %v3905_v59 = vpop.eup %2941  ;;  %v1174_v8 = vmul.f32 %v3903_v13, %v3903_v13 }
 0x2aa   :  { %1117 = vadd.xlane.f32.xlu1 %v3903_v13  ;;  %v1173_v45 = vmul.f32 %v3905_v59, %v3905_v59 }
 0x2ab   :  { %1115 = vadd.xlane.f32.xlu0 %v3905_v59  ;;  %v2480_v3 = vpop.f32.mrb[10].mxu1 }
 0x2ac   :  { %v966_v41 = vadd.f32 %v2480_v3, %v3837_v34  ;;  %v960_v32 = vpop.f32.mrb[11].mxu1 }
 0x2ad   :  { %v961_v24 = vadd.f32 %v3837_v34, %v960_v32 }
 0x2ae   :  { %2947 = vtanh.f32 %v966_v41  ;;  %1213 = vadd.xlane.f32.xlu1 %v1174_v8 }
 0x2af   :  { %2949 = vtanh.f32 %v961_v24  ;;  %1211 = vadd.xlane.f32.xlu0 %v1173_v45 }
 0x2b0   :  { %v3927_v16 = vpop.eup %2943 }
 0x2b1   :  { %v3929_v51 = vpop.eup %2945  ;;  %v1176_v39 = vmul.f32 %v3927_v16, %v3927_v16 }
 0x2b2   :  { %1121 = vadd.xlane.f32.xlu1 %v3927_v16  ;;  %v1175_v53 = vmul.f32 %v3929_v51, %v3929_v51 }
 0x2b3   :  { %1119 = vadd.xlane.f32.xlu0 %v3929_v51  ;;  %v2483_v22 = vpop.f32.mrb[12].mxu1 }
 0x2b4   :  { %v976_v35 = vadd.f32 %v2483_v22, %v3837_v34  ;;  %v970_v1 = vpop.f32.mrb[13].mxu1 }
 0x2b5   :  { %v971_v58 = vadd.f32 %v3837_v34, %v970_v1 }
 0x2b6   :  { %2951 = vtanh.f32 %v976_v35  ;;  %1217 = vadd.xlane.f32.xlu1 %v1176_v39 }
 0x2b7   :  { %2953 = vtanh.f32 %v971_v58  ;;  %1215 = vadd.xlane.f32.xlu0 %v1175_v53 }
 0x2b8   :  { %v3951_v43 = vpop.eup %2947 }
 0x2b9   :  { %v3953_v6 = vpop.eup %2949  ;;  %v1178_v31 = vmul.f32 %v3951_v43, %v3951_v43 }
 0x2ba   :  { %1125 = vadd.xlane.f32.xlu1 %v3951_v43  ;;  %v1177_v42 = vmul.f32 %v3953_v6, %v3953_v6 }
 0x2bb   :  { %1123 = vadd.xlane.f32.xlu0 %v3953_v6  ;;  %v2486_v33 = vpop.f32.mrb[14].mxu1 }
 0x2bc   :  { %v986_v11 = vadd.f32 %v2486_v33, %v3837_v34  ;;  %v980_v5 = vpop.f32.mrb[15].mxu1 }
 0x2bd   :  { %v981_v62 = vadd.f32 %v3837_v34, %v980_v5 }
 0x2be   :  { %2955 = vtanh.f32 %v986_v11  ;;  %1221 = vadd.xlane.f32.xlu1 %v1178_v31 }
 0x2bf   :  { %2957 = vtanh.f32 %v981_v62  ;;  %1219 = vadd.xlane.f32.xlu0 %v1177_v42 }
 0x2c0   :  { %v3963_v57 = vpop.eup %2951 }
 0x2c1   :  { %v3965_v54 = vpop.eup %2953  ;;  %v1180_v52 = vmul.f32 %v3963_v57, %v3963_v57 }
 0x2c2   :  { %1129 = vadd.xlane.f32.xlu1 %v3963_v57  ;;  %v1179_v40 = vmul.f32 %v3965_v54, %v3965_v54 }
 0x2c3   :  { %1127 = vadd.xlane.f32.xlu0 %v3965_v54  ;;  %v2489_v47 = vpop.f32.mrb[16].mxu1 }
 0x2c4   :  { %v996_v50 = vadd.f32 %v2489_v47, %v3837_v34  ;;  %v990_v61 = vpop.f32.mrb[17].mxu1 }
 0x2c5   :  { %v991_v12 = vadd.f32 %v3837_v34, %v990_v61 }
 0x2c6   :  { %2959 = vtanh.f32 %v996_v50  ;;  %1225 = vadd.xlane.f32.xlu1 %v1180_v52 }
 0x2c7   :  { %2961 = vtanh.f32 %v991_v12  ;;  %1223 = vadd.xlane.f32.xlu0 %v1179_v40 }
 0x2c8   :  { %v3975_v17 = vpop.eup %2955 }
 0x2c9   :  { %v3977_v19 = vpop.eup %2957  ;;  %v1182_v9 = vmul.f32 %v3975_v17, %v3975_v17 }
 0x2ca   :  { %1133 = vadd.xlane.f32.xlu1 %v3975_v17  ;;  %v1181_v26 = vmul.f32 %v3977_v19, %v3977_v19 }
 0x2cb   :  { %1131 = vadd.xlane.f32.xlu0 %v3977_v19  ;;  %v2492_v25 = vpop.f32.mrb[18].mxu1 }
 0x2cc   :  { %v1006_v46 = vadd.f32 %v2492_v25, %v3837_v34  ;;  %v1000_v20 = vpop.f32.mrb[19].mxu1 }
 0x2cd   :  { %v1001_v36 = vadd.f32 %v3837_v34, %v1000_v20 }
 0x2ce   :  { %2963 = vtanh.f32 %v1006_v46  ;;  %1229 = vadd.xlane.f32.xlu1 %v1182_v9 }
 0x2cf   :  { %2965 = vtanh.f32 %v1001_v36  ;;  %1227 = vadd.xlane.f32.xlu0 %v1181_v26 }
 0x2d0   :  { %v3987_v28 = vpop.eup %2959 }
 0x2d1   :  { %v3989_v38 = vpop.eup %2961  ;;  %v1184_v3 = vmul.f32 %v3987_v28, %v3987_v28 }
 0x2d2   :  { %1137 = vadd.xlane.f32.xlu1 %v3987_v28  ;;  %v1183_v0 = vmul.f32 %v3989_v38, %v3989_v38 }
 0x2d3   :  { %1135 = vadd.xlane.f32.xlu0 %v3989_v38  ;;  %v2495_v10 = vpop.f32.mrb[20].mxu1 }
 0x2d4   :  { %v1016_v21 = vadd.f32 %v2495_v10, %v3837_v34  ;;  %v1010_v37 = vpop.f32.mrb[21].mxu1 }
 0x2d5   :  { %v1011_v2 = vadd.f32 %v3837_v34, %v1010_v37 }
 0x2d6   :  { %2967 = vtanh.f32 %v1016_v21  ;;  %1233 = vadd.xlane.f32.xlu1 %v1184_v3 }
 0x2d7   :  { %2969 = vtanh.f32 %v1011_v2  ;;  %1231 = vadd.xlane.f32.xlu0 %v1183_v0 }
 0x2d8   :  { %v3999_v41 = vpop.eup %2963 }
 0x2d9   :  { %v4001_v32 = vpop.eup %2965  ;;  %v1186_v45 = vmul.f32 %v3999_v41, %v3999_v41 }
 0x2da   :  { %1141 = vadd.xlane.f32.xlu1 %v3999_v41  ;;  %v1185_v27 = vmul.f32 %v4001_v32, %v4001_v32 }
 0x2db   :  { %1139 = vadd.xlane.f32.xlu0 %v4001_v32  ;;  %v2498_v8 = vpop.f32.mrb[22].mxu1 }
 0x2dc   :  { %v1026_v49 = vadd.f32 %v2498_v8, %v3837_v34  ;;  %v1020_v24 = vpop.f32.mrb[23].mxu1 }
 0x2dd   :  { %v1021_v4 = vadd.f32 %v3837_v34, %v1020_v24 }
 0x2de   :  { %2971 = vtanh.f32 %v1026_v49  ;;  %1237 = vadd.xlane.f32.xlu1 %v1186_v45 }
 0x2df   :  { %2973 = vtanh.f32 %v1021_v4  ;;  %1235 = vadd.xlane.f32.xlu0 %v1185_v27 }
 0x2e0   :  { %v4011_v60 = vpop.eup %2967 }
 0x2e1   :  { %v4013_v22 = vpop.eup %2969  ;;  %v1188_v1 = vmul.f32 %v4011_v60, %v4011_v60 }
 0x2e2   :  { %1145 = vadd.xlane.f32.xlu1 %v4011_v60  ;;  %v1187_v55 = vmul.f32 %v4013_v22, %v4013_v22 }
 0x2e3   :  { %1143 = vadd.xlane.f32.xlu0 %v4013_v22  ;;  %v2501_v44 = vpop.f32.mrb[24].mxu1 }
 0x2e4   :  { %v1036_v29 = vadd.f32 %v2501_v44, %v3837_v34  ;;  %v1030_v35 = vpop.f32.mrb[25].mxu1 }
 0x2e5   :  { %v1031_v39 = vadd.f32 %v3837_v34, %v1030_v35 }
 0x2e6   :  { %2975 = vtanh.f32 %v1036_v29  ;;  %1241 = vadd.xlane.f32.xlu1 %v1188_v1 }
 0x2e7   :  { %2977 = vtanh.f32 %v1031_v39  ;;  %1239 = vadd.xlane.f32.xlu0 %v1187_v55 }
 0x2e8   :  { %v4023_v58 = vpop.eup %2971 }
 0x2e9   :  { %v4025_v53 = vpop.eup %2973  ;;  %v1190_v33 = vmul.f32 %v4023_v58, %v4023_v58 }
 0x2ea   :  { %1149 = vadd.xlane.f32.xlu1 %v4023_v58  ;;  %v1189_v5 = vmul.f32 %v4025_v53, %v4025_v53 }
 0x2eb   :  { %1147 = vadd.xlane.f32.xlu0 %v4025_v53  ;;  %v2504_v18 = vpop.f32.mrb[26].mxu1 }
 0x2ec   :  { %v1046_v7 = vadd.f32 %v2504_v18, %v3837_v34  ;;  %v1040_v48 = vpop.f32.mrb[27].mxu1 }
 0x2ed   :  { %v1041_v11 = vadd.f32 %v3837_v34, %v1040_v48 }
 0x2ee   :  { %2979 = vtanh.f32 %v1046_v7  ;;  %1245 = vadd.xlane.f32.xlu1 %v1190_v33 }
 0x2ef   :  { %2981 = vtanh.f32 %v1041_v11  ;;  %1243 = vadd.xlane.f32.xlu0 %v1189_v5 }
 0x2f0   :  { %v4035_v31 = vpop.eup %2975 }
 0x2f1   :  { %v4037_v62 = vpop.eup %2977  ;;  %v1192_v61 = vmul.f32 %v4035_v31, %v4035_v31 }
 0x2f2   :  { %1153 = vadd.xlane.f32.xlu1 %v4035_v31  ;;  %v1191_v12 = vmul.f32 %v4037_v62, %v4037_v62 }
 0x2f3   :  { %1151 = vadd.xlane.f32.xlu0 %v4037_v62  ;;  %v2507_v42 = vpop.f32.mrb[28].mxu1 }
 0x2f4   :  { %v1056_v47 = vadd.f32 %v2507_v42, %v3837_v34  ;;  %v1050_v50 = vpop.f32.mrb[29].mxu1 }
 0x2f5   :  { %v1051_v52 = vadd.f32 %v3837_v34, %v1050_v50 }
 0x2f6   :  { %2983 = vtanh.f32 %v1056_v47  ;;  %1249 = vadd.xlane.f32.xlu1 %v1192_v61 }
 0x2f7   :  { %2985 = vtanh.f32 %v1051_v52  ;;  %1247 = vadd.xlane.f32.xlu0 %v1191_v12 }
 0x2f8   :  { %v4047_v40 = vpop.eup %2979 }
 0x2f9   :  { %v4049_v25 = vpop.eup %2981  ;;  %v1194_v36 = vmul.f32 %v4047_v40, %v4047_v40 }
 0x2fa   :  { %1157 = vadd.xlane.f32.xlu1 %v4047_v40  ;;  %v1193_v10 = vmul.f32 %v4049_v25, %v4049_v25 }
 0x2fb   :  { %1155 = vadd.xlane.f32.xlu0 %v4049_v25  ;;  %v2510_v46 = vpop.f32.mrb[30].mxu1 }
 0x2fc   :  { %v1066_v20 = vadd.f32 %v2510_v46, %v3837_v34  ;;  %v1060_v9 = vpop.f32.mrb[31].mxu1 }
 0x2fd   :  { %v1061_v26 = vadd.f32 %v3837_v34, %v1060_v9 }
 0x2fe   :  { %2987 = vtanh.f32 %v1066_v20  ;;  %1253 = vadd.xlane.f32.xlu1 %v1194_v36 }
 0x2ff   :  { %2989 = vtanh.f32 %v1061_v26  ;;  %1251 = vadd.xlane.f32.xlu0 %v1193_v10 }
 0x300   :  { %v4059_v21 = vpop.eup %2983 }
 0x301   :  { %v4061_v37 = vpop.eup %2985  ;;  %v1196_v3 = vmul.f32 %v4059_v21, %v4059_v21 }
 0x302   :  { %1161 = vadd.xlane.f32.xlu1 %v4059_v21  ;;  %v1195_v34 = vmul.f32 %v4061_v37, %v4061_v37 }
 0x303   :  { %1159 = vadd.xlane.f32.xlu0 %v4061_v37 }
 0x306   :  { %1257 = vadd.xlane.f32.xlu1 %v1196_v3 }
 0x307   :  { %1255 = vadd.xlane.f32.xlu0 %v1195_v34 }
 0x308   :  { %v4069_v2 = vpop.eup %2987 }
 0x309   :  { %v4071_v0 = vpop.eup %2989  ;;  %v1198_v8 = vmul.f32 %v4069_v2, %v4069_v2 }
 0x30a   :  { %1165 = vadd.xlane.f32.xlu1 %v4069_v2  ;;  %v1197_v49 = vmul.f32 %v4071_v0, %v4071_v0 }
 0x30b   :  { %1163 = vadd.xlane.f32.xlu0 %v4071_v0 }
 0x30e   :  { %1261 = vadd.xlane.f32.xlu1 %v1198_v8 }
 0x30f   :  { %1259 = vadd.xlane.f32.xlu0 %v1197_v49 }
 0x31f   :  { %v1106_v24 = vpop.xlane.xlu1 %1105 }
 0x320   :  { %v1264_v45 = vmul.f32 0.03125, %v1106_v24  ;;  %v1104_v4 = vpop.xlane.xlu0 %1103 }
 0x321   :  { %v1263_v27 = vmul.f32 0.03125, %v1104_v4 }
 0x322   :  { %v1328_v29 = vmul.f32 %v1264_v45, %v1264_v45  ;;  %v1392_v24 = vsub.f32 %v3849_v23, %v1264_v45 }
 0x323   :  { %v1202_v44 = vpop.xlane.xlu1 %1201  ;;  %v1327_v39 = vmul.f32 %v1263_v27, %v1263_v27 }
 0x324   :  { %v1296_v35 = vmul.f32 0.03125, %v1202_v44  ;;  %v1200_v1 = vpop.xlane.xlu0 %1199 }
 0x325   :  { %v1295_v55 = vmul.f32 0.03125, %v1200_v1 }
 0x326   :  { %v1360_v18 = vsub.f32 %v1296_v35, %v1328_v29  ;;  %v1391_v29 = vsub.f32 %v3851_v14, %v1263_v27  ;;  %v1869_v14 = vld [vmem:[%s4548_s5] sm:$0xff]  ;;  %v1870_v27 = vld [vmem:[%s4548_s5 + $0x8] sm:$0xff] }
 0x327   :  { %v1359_v7 = vsub.f32 %v1295_v55, %v1327_v39  ;;  %v1110_v48 = vpop.xlane.xlu1 %1109  ;;  %v4098_v55 = vld [vmem:[%s4545_s1 + $0x4] ss:$0 sm:$0xff] }
 0x328   :  { %v1424_v33 = vadd.f32 1e-05, %v1360_v18  ;;  %v4079_v11 = vmul.f32 0.03125, %v1110_v48  ;;  %v1108_v5 = vpop.xlane.xlu0 %1107 }
 0x329   :  { %v1423_v42 = vadd.f32 1e-05, %v1359_v7  ;;  %v4081_v47 = vmul.f32 0.03125, %v1108_v5  ;;  %v1871_v5 = vld [vmem:[%s4548_s5 + $0x10] sm:$0xff] }
 0x32a   :  { %2991 = vrsqrt.f32 %v1424_v33  ;;  %v1330_v61 = vmul.f32 %v4079_v11, %v4079_v11 }
 0x32b   :  { %2993 = vrsqrt.f32 %v1423_v42  ;;  %v1206_v50 = vpop.xlane.xlu1 %1205  ;;  %v1329_v46 = vmul.f32 %v4081_v47, %v4081_v47 }
 0x32c   :  { %v1298_v52 = vmul.f32 0.03125, %v1206_v50  ;;  %v1204_v12 = vpop.xlane.xlu0 %1203 }
 0x32d   :  { %v1297_v20 = vmul.f32 0.03125, %v1204_v12  ;;  %v2767_v12 = vpack.c.bf16 %v1870_v27, %v1869_v14 }
 0x32e   :  { %v1362_v9 = vsub.f32 %v1298_v52, %v1330_v61  ;;  %v4114_v61 = vld [vmem:[%s4545_s1 + $0x5] ss:$0 sm:$0xff] }
 0x32f   :  { %v1361_v36 = vsub.f32 %v1297_v20, %v1329_v46  ;;  %v1114_v26 = vpop.xlane.xlu1 %1113  ;;  %v1872_v46 = vld [vmem:[%s4548_s5 + $0x18] sm:$0xff]  ;;  %2768 = vmatprep.subr.bf16.mxu1 %v2767_v12 }
 0x330   :  { %v1426_v10 = vadd.f32 1e-05, %v1362_v9  ;;  %v4087_v3 = vmul.f32 0.03125, %v1114_v26  ;;  %v1112_v34 = vpop.xlane.xlu0 %1111  ;;  %2770 = vmatpush3.bf16.msra.mxu1 %v2767_v12 }
 0x331   :  { %v1425_v8 = vadd.f32 1e-05, %v1361_v36  ;;  %v4089_v49 = vmul.f32 0.03125, %v1112_v34  ;;  %v1873_v34 = vld [vmem:[%s4548_s5 + $0x20] sm:$0xff] }
 0x332   :  { %2995 = vrsqrt.f32 %v1426_v10  ;;  %v1332_v35 = vmul.f32 %v4087_v3, %v4087_v3  ;;  %v2771_v10 = vpack.c.bf16 %v1872_v46, %v1871_v5 }
 0x333   :  { %2997 = vrsqrt.f32 %v1425_v8  ;;  %v1210_v4 = vpop.xlane.xlu1 %1209  ;;  %v1331_v23 = vmul.f32 %v4089_v49, %v4089_v49  ;;  %v1874_v8 = vld [vmem:[%s4548_s5 + $0x28] sm:$0xff] }
 0x334   :  { %v2992_v44 = vpop.eup %2991  ;;  %v1300_v1 = vmul.f32 0.03125, %v1210_v4  ;;  %v1208_v39 = vpop.xlane.xlu0 %1207  ;;  %2772 = vmatprep.subr.bf16.mxu1 %v2771_v10 }
 0x335   :  { %v2994_v18 = vpop.eup %2993  ;;  %v1488_v7 = vmul.f32 %v2992_v44, %v1392_v24  ;;  %v1299_v45 = vmul.f32 0.03125, %v1208_v39  ;;  %v2775_v39 = vpack.c.bf16 %v1874_v8, %v1873_v34  ;;  %2774 = vmatpush3.bf16.msra.mxu1 %v2771_v10  ;;  %v1396_v10 = vsub.f32 %v3879_v56, %v4087_v3 }
 0x336   :  { %v1364_v48 = vsub.f32 %v1300_v1, %v1332_v35  ;;  %v1487_v33 = vmul.f32 %v2994_v18, %v1391_v29  ;;  %v1394_v29 = vsub.f32 %v3861_v63, %v4079_v11  ;;  %v1875_v63 = vld [vmem:[%s4548_s5 + $0x30] sm:$0xff]  ;;  %v1876_v11 = vld [vmem:[%s4548_s5 + $0x38] sm:$0xff] }
 0x337   :  { %v1363_v42 = vsub.f32 %v1299_v45, %v1331_v23  ;;  %v1118_v50 = vpop.xlane.xlu1 %1117  ;;  %v1524_v52 = vmul.f32 %v4098_v55, %v1488_v7  ;;  %v1393_v7 = vsub.f32 %v3863_v15, %v4081_v47  ;;  %2776 = vmatprep.subr.bf16.mxu1 %v2775_v39  ;;  %v2779_v12 = vpack.c.bf16 %v1876_v11, %v1875_v63 }
 0x338   :  { %v1428_v20 = vadd.f32 1e-05, %v1364_v48  ;;  %v4120_v9 = vmul.f32 0.03125, %v1118_v50  ;;  %v1116_v36 = vpop.xlane.xlu0 %1115  ;;  %v1523_v26 = vmul.f32 %v4098_v55, %v1487_v33 }
 0x339   :  { %v1427_v24 = vadd.f32 1e-05, %v1363_v42  ;;  %v4129_v4 = vmul.f32 0.03125, %v1116_v36  ;;  %v1560_v1 = vadd.f32 %v4114_v61, %v1524_v52  ;;  %2778 = vmatpush3.bf16.msra.mxu1 %v2775_v39 }
 0x33a   :  { %2999 = vrsqrt.f32 %v1428_v20  ;;  %v1559_v44 = vadd.f32 %v4114_v61, %v1523_v26  ;;  %v1334_v23 = vmul.f32 %v4120_v9, %v4120_v9  ;;  %2780 = vmatprep.subr.bf16.mxu1 %v2779_v12 }
 0x33b   :  { %3001 = vrsqrt.f32 %v1427_v24  ;;  %v1214_v35 = vpop.xlane.xlu1 %1213  ;;  %v1333_v14 = vmul.f32 %v4129_v4, %v4129_v4 }
 0x33c   :  { %v2996_v18 = vpop.eup %2995  ;;  %v1302_v45 = vmul.f32 0.03125, %v1214_v35  ;;  %2543 = vmatprep.mubr.f32.mxu0 %v1559_v44  ;;  %v1212_v48 = vpop.xlane.xlu0 %1211 }
 0x33d   :  { %v2998_v33 = vpop.eup %2997  ;;  %v1301_v27 = vmul.f32 0.03125, %v1212_v48  ;;  %2544 = vmatmul.mubr.f32.vlgmr.msra.gmra.mrb[32].mxu0 %v1560_v1  ;;  %v1490_v15 = vmul.f32 %v2996_v18, %v1394_v29  ;;  %v1395_v1 = vsub.f32 %v3881_v30, %v4089_v49  ;;  %2782 = vmatpush3.bf16.msra.mxu1 %v2779_v12 }
 0x33e   :  { %v1366_v47 = vsub.f32 %v1302_v45, %v1334_v23  ;;  %v1489_v5 = vmul.f32 %v2998_v33, %v1393_v7 }
 0x33f   :  { %v1365_v42 = vsub.f32 %v1301_v27, %v1333_v14  ;;  %v1122_v50 = vpop.xlane.xlu1 %1121  ;;  %v1526_v52 = vmul.f32 %v4098_v55, %v1490_v15 }
 0x340   :  { %v1430_v46 = vadd.f32 1e-05, %v1366_v47  ;;  %v4148_v20 = vmul.f32 0.03125, %v1122_v50  ;;  %v1120_v36 = vpop.xlane.xlu0 %1119  ;;  %v1525_v26 = vmul.f32 %v4098_v55, %v1489_v5  ;;  %v1398_v50 = vsub.f32 %v3903_v13, %v4120_v9 }
 0x341   :  { %v1429_v34 = vadd.f32 1e-05, %v1365_v42  ;;  %v4151_v8 = vmul.f32 0.03125, %v1120_v36  ;;  %v1562_v29 = vadd.f32 %v4114_v61, %v1526_v52  ;;  %v1397_v36 = vsub.f32 %v3905_v59, %v4129_v4 }
 0x342   :  { %3003 = vrsqrt.f32 %v1430_v46  ;;  %v1561_v24 = vadd.f32 %v4114_v61, %v1525_v26  ;;  %v1336_v18 = vmul.f32 %v4148_v20, %v4148_v20 }
 0x343   :  { %3005 = vrsqrt.f32 %v1429_v34  ;;  %v1218_v44 = vpop.xlane.xlu1 %1217  ;;  %v1335_v39 = vmul.f32 %v4151_v8, %v4151_v8 }
 0x344   :  { %v3000_v35 = vpop.eup %2999  ;;  %v1304_v7 = vmul.f32 0.03125, %v1218_v44  ;;  %v1216_v23 = vpop.xlane.xlu0 %1215  ;;  %2546 = vmatprep.mubr.f32.mxu0 %v1561_v24 }
 0x345   :  { %v3002_v45 = vpop.eup %3001  ;;  %v1303_v56 = vmul.f32 0.03125, %v1216_v23  ;;  %2547 = vmatmul.mubr.f32.gmra.mrb[34].mxu0 %v1562_v29  ;;  %v1492_v3 = vmul.f32 %v3000_v35, %v1396_v10 }
 0x346   :  { %v1368_v48 = vsub.f32 %v1304_v7, %v1336_v18  ;;  %v1491_v63 = vmul.f32 %v3002_v45, %v1395_v1 }
 0x347   :  { %v1367_v11 = vsub.f32 %v1303_v56, %v1335_v39  ;;  %v1126_v33 = vpop.xlane.xlu1 %1125  ;;  %v1528_v30 = vmul.f32 %v4098_v55, %v1492_v3 }
 0x348   :  { %v1432_v49 = vadd.f32 1e-05, %v1368_v48  ;;  %v4164_v14 = vmul.f32 0.03125, %v1126_v33  ;;  %v1124_v27 = vpop.xlane.xlu0 %1123  ;;  %v1527_v15 = vmul.f32 %v4098_v55, %v1491_v63  ;;  %v1400_v48 = vsub.f32 %v3927_v16, %v4148_v20 }
 0x349   :  { %v1431_v47 = vadd.f32 1e-05, %v1367_v11  ;;  %v4167_v5 = vmul.f32 0.03125, %v1124_v27  ;;  %v1564_v12 = vadd.f32 %v4114_v61, %v1528_v30  ;;  %v1399_v30 = vsub.f32 %v3929_v51, %v4151_v8 }
 0x34a   :  { %3007 = vrsqrt.f32 %v1432_v49  ;;  %v1563_v42 = vadd.f32 %v4114_v61, %v1527_v15  ;;  %v1338_v26 = vmul.f32 %v4164_v14, %v4164_v14 }
 0x34b   :  { %3009 = vrsqrt.f32 %v1431_v47  ;;  %v1222_v52 = vpop.xlane.xlu1 %1221  ;;  %v1337_v44 = vmul.f32 %v4167_v5, %v4167_v5 }
 0x34c   :  { %v3004_v46 = vpop.eup %3003  ;;  %v1306_v34 = vmul.f32 0.03125, %v1222_v52  ;;  %v1220_v24 = vpop.xlane.xlu0 %1219  ;;  %2549 = vmatprep.mubr.f32.mxu0 %v1563_v42 }
 0x34d   :  { %v3006_v10 = vpop.eup %3005  ;;  %v1305_v29 = vmul.f32 0.03125, %v1220_v24  ;;  %2550 = vmatmul.mubr.f32.gmra.mrb[36].mxu0 %v1564_v12  ;;  %v1494_v13 = vmul.f32 %v3004_v46, %v1398_v50 }
 0x34e   :  { %v1370_v9 = vsub.f32 %v1306_v34, %v1338_v26  ;;  %v1493_v35 = vmul.f32 %v3006_v10, %v1397_v36 }
 0x34f   :  { %v1369_v1 = vsub.f32 %v1305_v29, %v1337_v44  ;;  %v1130_v18 = vpop.xlane.xlu1 %1129  ;;  %v1530_v7 = vmul.f32 %v4098_v55, %v1494_v13  ;;  %v1402_v29 = vsub.f32 %v3951_v43, %v4164_v14 }
 0x350   :  { %v1434_v59 = vadd.f32 1e-05, %v1370_v9  ;;  %v4180_v4 = vmul.f32 0.03125, %v1130_v18  ;;  %v1128_v23 = vpop.xlane.xlu0 %1127  ;;  %v1529_v45 = vmul.f32 %v4098_v55, %v1493_v35 }
 0x351   :  { %v1433_v39 = vadd.f32 1e-05, %v1369_v1  ;;  %v4183_v56 = vmul.f32 0.03125, %v1128_v23  ;;  %v1566_v11 = vadd.f32 %v4114_v61, %v1530_v7  ;;  %v1401_v1 = vsub.f32 %v3953_v6, %v4167_v5 }
 0x352   :  { %3011 = vrsqrt.f32 %v1434_v59  ;;  %v1565_v3 = vadd.f32 %v4114_v61, %v1529_v45  ;;  %v1340_v49 = vmul.f32 %v4180_v4, %v4180_v4 }
 0x353   :  { %3013 = vrsqrt.f32 %v1433_v39  ;;  %v1226_v63 = vpop.xlane.xlu1 %1225  ;;  %v1339_v42 = vmul.f32 %v4183_v56, %v4183_v56 }
 0x354   :  { %v3008_v33 = vpop.eup %3007  ;;  %v1308_v27 = vmul.f32 0.03125, %v1226_v63  ;;  %v1224_v15 = vpop.xlane.xlu0 %1223  ;;  %2552 = vmatprep.mubr.f32.mxu0 %v1565_v3 }
 0x355   :  { %v3010_v47 = vpop.eup %3009  ;;  %v1307_v50 = vmul.f32 0.03125, %v1224_v15  ;;  %2553 = vmatmul.mubr.f32.gmra.mrb[38].mxu0 %v1566_v11  ;;  %v1496_v16 = vmul.f32 %v3008_v33, %v1400_v48 }
 0x356   :  { %v1372_v20 = vsub.f32 %v1308_v27, %v1340_v49  ;;  %v1495_v52 = vmul.f32 %v3010_v47, %v1399_v30  ;;  %v1404_v47 = vsub.f32 %v3963_v57, %v4180_v4 }
 0x357   :  { %v1371_v12 = vsub.f32 %v1307_v50, %v1339_v42  ;;  %v1134_v46 = vpop.xlane.xlu1 %1133  ;;  %v1532_v36 = vmul.f32 %v4098_v55, %v1496_v16 }
 0x358   :  { %v1436_v51 = vadd.f32 1e-05, %v1372_v20  ;;  %v4196_v8 = vmul.f32 0.03125, %v1134_v46  ;;  %v1132_v26 = vpop.xlane.xlu0 %1131  ;;  %v1531_v34 = vmul.f32 %v4098_v55, %v1495_v52  ;;  %v1403_v20 = vsub.f32 %v3965_v54, %v4183_v56 }
 0x359   :  { %v1435_v24 = vadd.f32 1e-05, %v1371_v12  ;;  %v4199_v10 = vmul.f32 0.03125, %v1132_v26  ;;  %v1568_v9 = vadd.f32 %v4114_v61, %v1532_v36 }
 0x35a   :  { %3015 = vrsqrt.f32 %v1436_v51  ;;  %v1567_v44 = vadd.f32 %v4114_v61, %v1531_v34  ;;  %v1342_v18 = vmul.f32 %v4196_v8, %v4196_v8 }
 0x35b   :  { %3017 = vrsqrt.f32 %v1435_v24  ;;  %v1230_v13 = vpop.xlane.xlu1 %1229  ;;  %v1341_v45 = vmul.f32 %v4199_v10, %v4199_v10 }
 0x35c   :  { %v3012_v35 = vpop.eup %3011  ;;  %v1310_v7 = vmul.f32 0.03125, %v1230_v13  ;;  %v1228_v59 = vpop.xlane.xlu0 %1227  ;;  %2555 = vmatprep.mubr.f32.mxu0 %v1567_v44 }
 0x35d   :  { %v3014_v23 = vpop.eup %3013  ;;  %v1309_v39 = vmul.f32 0.03125, %v1228_v59  ;;  %2556 = vmatmul.mubr.f32.gmra.mrb[40].mxu0 %v1568_v9  ;;  %v1498_v43 = vmul.f32 %v3012_v35, %v1402_v29 }
 0x35e   :  { %v1374_v14 = vsub.f32 %v1310_v7, %v1342_v18  ;;  %v1497_v3 = vmul.f32 %v3014_v23, %v1401_v1  ;;  %v1406_v7 = vsub.f32 %v3975_v17, %v4196_v8 }
 0x35f   :  { %v1373_v48 = vsub.f32 %v1309_v39, %v1341_v45  ;;  %v1138_v63 = vpop.xlane.xlu1 %1137  ;;  %v1534_v11 = vmul.f32 %v4098_v55, %v1498_v43  ;;  %v1405_v39 = vsub.f32 %v3977_v19, %v4199_v10 }
 0x360   :  { %v1438_v6 = vadd.f32 1e-05, %v1374_v14  ;;  %v4212_v5 = vmul.f32 0.03125, %v1138_v63  ;;  %v1136_v33 = vpop.xlane.xlu0 %1135  ;;  %v1533_v30 = vmul.f32 %v4098_v55, %v1497_v3 }
 0x361   :  { %v1437_v49 = vadd.f32 1e-05, %v1373_v48  ;;  %v4215_v27 = vmul.f32 0.03125, %v1136_v33  ;;  %v1570_v50 = vadd.f32 %v4114_v61, %v1534_v11 }
 0x362   :  { %3019 = vrsqrt.f32 %v1438_v6  ;;  %v1569_v15 = vadd.f32 %v4114_v61, %v1533_v30  ;;  %v1344_v52 = vmul.f32 %v4212_v5, %v4212_v5 }
 0x363   :  { %3021 = vrsqrt.f32 %v1437_v49  ;;  %v1234_v42 = vpop.xlane.xlu1 %1233  ;;  %v1343_v51 = vmul.f32 %v4215_v27, %v4215_v27 }
 0x364   :  { %v3016_v16 = vpop.eup %3015  ;;  %v1312_v12 = vmul.f32 0.03125, %v1234_v42  ;;  %v1232_v46 = vpop.xlane.xlu0 %1231  ;;  %2558 = vmatprep.mubr.f32.mxu0 %v1569_v15 }
 0x365   :  { %v3018_v36 = vpop.eup %3017  ;;  %v1311_v26 = vmul.f32 0.03125, %v1232_v46  ;;  %2559 = vmatmul.mubr.f32.gmra.mrb[42].mxu0 %v1570_v50  ;;  %v1500_v57 = vmul.f32 %v3016_v16, %v1404_v47 }
 0x366   :  { %v1376_v4 = vsub.f32 %v1312_v12, %v1344_v52  ;;  %v1499_v34 = vmul.f32 %v3018_v36, %v1403_v20  ;;  %v1408_v20 = vsub.f32 %v3987_v28, %v4212_v5  ;;  %v1407_v36 = vsub.f32 %v3989_v38, %v4215_v27 }
 0x367   :  { %v1375_v24 = vsub.f32 %v1311_v26, %v1343_v51  ;;  %v1142_v44 = vpop.xlane.xlu1 %1141  ;;  %v1536_v29 = vmul.f32 %v4098_v55, %v1500_v57 }
 0x368   :  { %v1440_v54 = vadd.f32 1e-05, %v1376_v4  ;;  %v4228_v56 = vmul.f32 0.03125, %v1142_v44  ;;  %v1140_v13 = vpop.xlane.xlu0 %1139  ;;  %v1535_v9 = vmul.f32 %v4098_v55, %v1499_v34 }
 0x369   :  { %v1439_v35 = vadd.f32 1e-05, %v1375_v24  ;;  %v4231_v1 = vmul.f32 0.03125, %v1140_v13  ;;  %v1572_v23 = vadd.f32 %v4114_v61, %v1536_v29 }
 0x36a   :  { %3023 = vrsqrt.f32 %v1440_v54  ;;  %v1571_v18 = vadd.f32 %v4114_v61, %v1535_v9  ;;  %v1346_v43 = vmul.f32 %v4228_v56, %v4228_v56 }
 0x36b   :  { %3025 = vrsqrt.f32 %v1439_v35  ;;  %v1238_v59 = vpop.xlane.xlu1 %1237  ;;  %v1345_v63 = vmul.f32 %v4231_v1, %v4231_v1 }
 0x36c   :  { %v3020_v45 = vpop.eup %3019  ;;  %v1314_v14 = vmul.f32 0.03125, %v1238_v59  ;;  %v1236_v3 = vpop.xlane.xlu0 %1235  ;;  %2561 = vmatprep.mubr.f32.mxu0 %v1571_v18 }
 0x36d   :  { %v3022_v48 = vpop.eup %3021  ;;  %v1313_v11 = vmul.f32 0.03125, %v1236_v3  ;;  %2562 = vmatmul.mubr.f32.gmra.mrb[44].mxu0 %v1572_v23  ;;  %v1502_v17 = vmul.f32 %v3020_v45, %v1406_v7  ;;  %v1410_v23 = vsub.f32 %v3999_v41, %v4228_v56 }
 0x36e   :  { %v1378_v8 = vsub.f32 %v1314_v14, %v1346_v43  ;;  %v1501_v6 = vmul.f32 %v3022_v48, %v1405_v39  ;;  %v1409_v14 = vsub.f32 %v4001_v32, %v4231_v1 }
 0x36f   :  { %v1377_v33 = vsub.f32 %v1313_v11, %v1345_v63  ;;  %v1146_v30 = vpop.xlane.xlu1 %1145  ;;  %v1538_v49 = vmul.f32 %v4098_v55, %v1502_v17 }
 0x370   :  { %v1442_v19 = vadd.f32 1e-05, %v1378_v8  ;;  %v4244_v10 = vmul.f32 0.03125, %v1146_v30  ;;  %v1144_v15 = vpop.xlane.xlu0 %1143  ;;  %v1537_v47 = vmul.f32 %v4098_v55, %v1501_v6 }
 0x371   :  { %v1441_v42 = vadd.f32 1e-05, %v1377_v33  ;;  %v4247_v50 = vmul.f32 0.03125, %v1144_v15  ;;  %v1574_v12 = vadd.f32 %v4114_v61, %v1538_v49 }
 0x372   :  { %3027 = vrsqrt.f32 %v1442_v19  ;;  %v1573_v16 = vadd.f32 %v4114_v61, %v1537_v47  ;;  %v1348_v51 = vmul.f32 %v4244_v10, %v4244_v10 }
 0x373   :  { %3029 = vrsqrt.f32 %v1441_v42  ;;  %v1242_v52 = vpop.xlane.xlu1 %1241  ;;  %v1347_v34 = vmul.f32 %v4247_v50, %v4247_v50 }
 0x374   :  { %v3024_v46 = vpop.eup %3023  ;;  %v1316_v26 = vmul.f32 0.03125, %v1242_v52  ;;  %v1240_v57 = vpop.xlane.xlu0 %1239  ;;  %2564 = vmatprep.mubr.f32.mxu0 %v1573_v16 }
 0x375   :  { %v3026_v4 = vpop.eup %3025  ;;  %v1315_v24 = vmul.f32 0.03125, %v1240_v57  ;;  %2565 = vmatmul.mubr.f32.gmra.mrb[46].mxu0 %v1574_v12  ;;  %v1504_v28 = vmul.f32 %v3024_v46, %v1408_v20  ;;  %v1412_v20 = vsub.f32 %v4011_v60, %v4244_v10 }
 0x376   :  { %v1380_v5 = vsub.f32 %v1316_v26, %v1348_v51  ;;  %v1503_v44 = vmul.f32 %v3026_v4, %v1407_v36  ;;  %v1411_v36 = vsub.f32 %v4013_v22, %v4247_v50 }
 0x377   :  { %v1379_v29 = vsub.f32 %v1315_v24, %v1347_v34  ;;  %v1150_v54 = vpop.xlane.xlu1 %1149  ;;  %v1540_v13 = vmul.f32 %v4098_v55, %v1504_v28 }
 0x378   :  { %v1444_v38 = vadd.f32 1e-05, %v1380_v5  ;;  %v4260_v27 = vmul.f32 0.03125, %v1150_v54  ;;  %v1148_v9 = vpop.xlane.xlu0 %1147  ;;  %v1539_v35 = vmul.f32 %v4098_v55, %v1503_v44 }
 0x379   :  { %v1443_v18 = vadd.f32 1e-05, %v1379_v29  ;;  %v4263_v7 = vmul.f32 0.03125, %v1148_v9  ;;  %v1576_v39 = vadd.f32 %v4114_v61, %v1540_v13 }
 0x37a   :  { %3031 = vrsqrt.f32 %v1444_v38  ;;  %v1575_v59 = vadd.f32 %v4114_v61, %v1539_v35  ;;  %v1350_v3 = vmul.f32 %v4260_v27, %v4260_v27 }
 0x37b   :  { %3033 = vrsqrt.f32 %v1443_v18  ;;  %v1246_v45 = vpop.xlane.xlu1 %1245  ;;  %v1349_v17 = vmul.f32 %v4263_v7, %v4263_v7  ;;  %v1414_v18 = vsub.f32 %v4023_v58, %v4260_v27 }
 0x37c   :  { %v3028_v43 = vpop.eup %3027  ;;  %v1318_v48 = vmul.f32 0.03125, %v1246_v45  ;;  %v1244_v63 = vpop.xlane.xlu0 %1243  ;;  %2567 = vmatprep.mubr.f32.mxu0 %v1575_v59 }
 0x37d   :  { %v3030_v11 = vpop.eup %3029  ;;  %v1317_v8 = vmul.f32 0.03125, %v1244_v63  ;;  %2568 = vmatmul.mubr.f32.gmra.mrb[48].mxu0 %v1576_v39  ;;  %v1506_v41 = vmul.f32 %v3028_v43, %v1410_v23  ;;  %v1413_v39 = vsub.f32 %v4025_v53, %v4263_v7  ;;  %v1878_v53 = vld [vmem:[%s4548_s5 + $0x48] sm:$0xff] }
 0x37e   :  { %v1382_v56 = vsub.f32 %v1318_v48, %v1350_v3  ;;  %v1505_v6 = vmul.f32 %v3030_v11, %v1409_v14 }
 0x37f   :  { %v1381_v33 = vsub.f32 %v1317_v8, %v1349_v17  ;;  %v1154_v30 = vpop.xlane.xlu1 %1153  ;;  %v1542_v49 = vmul.f32 %v4098_v55, %v1506_v41  ;;  %v1877_v8 = vld [vmem:[%s4548_s5 + $0x40] sm:$0xff] }
 0x380   :  { %v1446_v32 = vadd.f32 1e-05, %v1382_v56  ;;  %v4276_v1 = vmul.f32 0.03125, %v1154_v30  ;;  %v1152_v19 = vpop.xlane.xlu0 %1151  ;;  %v1541_v15 = vmul.f32 %v4098_v55, %v1505_v6  ;;  %v2783_v6 = vpack.c.bf16 %v1878_v53, %v1877_v8 }
 0x381   :  { %v1445_v47 = vadd.f32 1e-05, %v1381_v33  ;;  %v4279_v42 = vmul.f32 0.03125, %v1152_v19  ;;  %v1578_v12 = vadd.f32 %v4114_v61, %v1542_v49 }
 0x382   :  { %3035 = vrsqrt.f32 %v1446_v32  ;;  %v1577_v16 = vadd.f32 %v4114_v61, %v1541_v15  ;;  %v1352_v51 = vmul.f32 %v4276_v1, %v4276_v1  ;;  %2784 = vmatprep.subr.bf16.mxu1 %v2783_v6 }
 0x383   :  { %3037 = vrsqrt.f32 %v1445_v47  ;;  %v1250_v52 = vpop.xlane.xlu1 %1249  ;;  %v1351_v34 = vmul.f32 %v4279_v42, %v4279_v42  ;;  %2786 = vmatpush3.bf16.msra.mxu1 %v2783_v6 }
 0x384   :  { %v3032_v46 = vpop.eup %3031  ;;  %v1320_v26 = vmul.f32 0.03125, %v1250_v52  ;;  %v1248_v57 = vpop.xlane.xlu0 %1247  ;;  %2570 = vmatprep.mubr.f32.mxu0 %v1577_v16  ;;  %v1879_v16 = vld [vmem:[%s4548_s5 + $0x50] sm:$0xff]  ;;  %v1416_v52 = vsub.f32 %v4035_v31, %v4276_v1 }
 0x385   :  { %v3034_v4 = vpop.eup %3033  ;;  %v1319_v24 = vmul.f32 0.03125, %v1248_v57  ;;  %2571 = vmatmul.mubr.f32.gmra.mrb[50].mxu0 %v1578_v12  ;;  %v1508_v60 = vmul.f32 %v3032_v46, %v1412_v20  ;;  %v1880_v20 = vld [vmem:[%s4548_s5 + $0x58] sm:$0xff] }
 0x386   :  { %v1384_v10 = vsub.f32 %v1320_v26, %v1352_v51  ;;  %v1507_v28 = vmul.f32 %v3034_v4, %v1411_v36  ;;  %v2787_v36 = vpack.c.bf16 %v1880_v20, %v1879_v16  ;;  %v1415_v26 = vsub.f32 %v4037_v62, %v4279_v42  ;;  %v1881_v62 = vld [vmem:[%s4548_s5 + $0x60] sm:$0xff]  ;;  %v1882_v42 = vld [vmem:[%s4548_s5 + $0x68] sm:$0xff] }
 0x387   :  { %v1383_v5 = vsub.f32 %v1319_v24, %v1351_v34  ;;  %v1158_v44 = vpop.xlane.xlu1 %1157  ;;  %v1544_v29 = vmul.f32 %v4098_v55, %v1508_v60 }
 0x388   :  { %v1448_v22 = vadd.f32 1e-05, %v1384_v10  ;;  %v4292_v50 = vmul.f32 0.03125, %v1158_v44  ;;  %v1156_v54 = vpop.xlane.xlu0 %1155  ;;  %v1543_v13 = vmul.f32 %v4098_v55, %v1507_v28  ;;  %2788 = vmatprep.subr.bf16.mxu1 %v2787_v36 }
 0x389   :  { %v1447_v38 = vadd.f32 1e-05, %v1383_v5  ;;  %v4295_v9 = vmul.f32 0.03125, %v1156_v54  ;;  %v1580_v23 = vadd.f32 %v4114_v61, %v1544_v29  ;;  %2790 = vmatpush3.bf16.msra.mxu1 %v2787_v36 }
 0x38a   :  { %3039 = vrsqrt.f32 %v1448_v22  ;;  %v1579_v35 = vadd.f32 %v4114_v61, %v1543_v13  ;;  %v1354_v43 = vmul.f32 %v4292_v50, %v4292_v50  ;;  %v2791_v22 = vpack.c.bf16 %v1882_v42, %v1881_v62 }
 0x38b   :  { %3041 = vrsqrt.f32 %v1447_v38  ;;  %v1254_v59 = vpop.xlane.xlu1 %1253  ;;  %v1353_v63 = vmul.f32 %v4295_v9, %v4295_v9 }
 0x38c   :  { %v3036_v45 = vpop.eup %3035  ;;  %v1322_v14 = vmul.f32 0.03125, %v1254_v59  ;;  %v1252_v3 = vpop.xlane.xlu0 %1251  ;;  %2573 = vmatprep.mubr.f32.mxu0 %v1579_v35  ;;  %2792 = vmatprep.subr.bf16.mxu1 %v2791_v22 }
 0x38d   :  { %v3038_v48 = vpop.eup %3037  ;;  %v1321_v11 = vmul.f32 0.03125, %v1252_v3  ;;  %2574 = vmatmul.mubr.f32.gmra.mrb[52].mxu0 %v1580_v23  ;;  %v1510_v58 = vmul.f32 %v3036_v45, %v1414_v18  ;;  %2794 = vmatpush3.bf16.msra.mxu1 %v2791_v22  ;;  %v1883_v45 = vld [vmem:[%s4548_s5 + $0x70] sm:$0xff] }
 0x38e   :  { %v1386_v27 = vsub.f32 %v1322_v14, %v1354_v43  ;;  %v1509_v17 = vmul.f32 %v3038_v48, %v1413_v39  ;;  %v1884_v39 = vld [vmem:[%s4548_s5 + $0x78] sm:$0xff]  ;;  %v1418_v43 = vsub.f32 %v4047_v40, %v4292_v50 }
 0x38f   :  { %v1385_v7 = vsub.f32 %v1321_v11, %v1353_v63  ;;  %v1162_v41 = vpop.xlane.xlu1 %1161  ;;  %v1546_v56 = vmul.f32 %v4098_v55, %v1510_v58  ;;  %v2795_v48 = vpack.c.bf16 %v1884_v39, %v1883_v45  ;;  %v1417_v11 = vsub.f32 %v4049_v25, %v4295_v9 }
 0x390   :  { %v1450_v33 = vadd.f32 1e-05, %v1386_v27  ;;  %v4314_v30 = vmul.f32 0.03125, %v1162_v41  ;;  %v1160_v49 = vpop.xlane.xlu0 %1159  ;;  %v1545_v32 = vmul.f32 %v4098_v55, %v1509_v17 }
 0x391   :  { %v1449_v19 = vadd.f32 1e-05, %v1385_v7  ;;  %v4317_v15 = vmul.f32 0.03125, %v1160_v49  ;;  %v1582_v46 = vadd.f32 %v4114_v61, %v1546_v56  ;;  %2796 = vmatprep.subr.bf16.mxu1 %v2795_v48 }
 0x392   :  { %3043 = vrsqrt.f32 %v1450_v33  ;;  %v1581_v47 = vadd.f32 %v4114_v61, %v1545_v32  ;;  %v1356_v57 = vmul.f32 %v4314_v30, %v4314_v30  ;;  %2798 = vmatpush3.bf16.msra.mxu1 %v2795_v48  ;;  %v1420_v32 = vsub.f32 %v4059_v21, %v4314_v30 }
 0x393   :  { %3045 = vrsqrt.f32 %v1449_v19  ;;  %v1258_v12 = vpop.xlane.xlu1 %1257  ;;  %v1355_v60 = vmul.f32 %v4317_v15, %v4317_v15  ;;  %v1419_v16 = vsub.f32 %v4061_v37, %v4317_v15 }
 0x394   :  { %v3040_v51 = vpop.eup %3039  ;;  %v1324_v4 = vmul.f32 0.03125, %v1258_v12  ;;  %v1256_v34 = vpop.xlane.xlu0 %1255  ;;  %2576 = vmatprep.mubr.f32.mxu0 %v1581_v47 }
 0x395   :  { %v3042_v24 = vpop.eup %3041  ;;  %v1323_v31 = vmul.f32 0.03125, %v1256_v34  ;;  %2577 = vmatmul.mubr.f32.gmra.mrb[54].mxu0 %v1582_v46  ;;  %v1512_v1 = vmul.f32 %v3040_v51, %v1416_v52 }
 0x396   :  { %v1388_v10 = vsub.f32 %v1324_v4, %v1356_v57  ;;  %v1511_v28 = vmul.f32 %v3042_v24, %v1415_v26 }
 0x397   :  { %v1387_v5 = vsub.f32 %v1323_v31, %v1355_v60  ;;  %v1166_v44 = vpop.xlane.xlu1 %1165  ;;  %v1548_v29 = vmul.f32 %v4098_v55, %v1512_v1 }
 0x398   :  { %v1452_v54 = vadd.f32 1e-05, %v1388_v10  ;;  %v1294_v13 = vmul.f32 0.03125, %v1166_v44  ;;  %v1164_v38 = vpop.xlane.xlu0 %1163  ;;  %v1547_v35 = vmul.f32 %v4098_v55, %v1511_v28 }
 0x399   :  { %v1451_v18 = vadd.f32 1e-05, %v1387_v5  ;;  %v1293_v59 = vmul.f32 0.03125, %v1164_v38  ;;  %v1584_v3 = vadd.f32 %v4114_v61, %v1548_v29 }
 0x39a   :  { %3047 = vrsqrt.f32 %v1452_v54  ;;  %v1583_v23 = vadd.f32 %v4114_v61, %v1547_v35  ;;  %v1358_v58 = vmul.f32 %v1294_v13, %v1294_v13  ;;  %v1422_v21 = vsub.f32 %v4069_v2, %v1294_v13  ;;  %v4376_v2 = vld [vmem:[%s4545_s1 + $0x6] ss:$0 sm:$0xff] }
 0x39b   :  { %3049 = vrsqrt.f32 %v1451_v18  ;;  %v1262_v14 = vpop.xlane.xlu1 %1261  ;;  %v1357_v53 = vmul.f32 %v1293_v59, %v1293_v59  ;;  %v1421_v57 = vsub.f32 %v4071_v0, %v1293_v59 }
 0x39c   :  { %v3044_v63 = vpop.eup %3043  ;;  %v1326_v27 = vmul.f32 0.03125, %v1262_v14  ;;  %v1260_v17 = vpop.xlane.xlu0 %1259  ;;  %2579 = vmatprep.mubr.f32.mxu0 %v1583_v23 }
 0x39d   :  { %v3046_v8 = vpop.eup %3045  ;;  %v1325_v7 = vmul.f32 0.03125, %v1260_v17  ;;  %2580 = vmatmul.mubr.f32.gmra.mrb[56].mxu0 %v1584_v3  ;;  %v1514_v41 = vmul.f32 %v3044_v63, %v1418_v43 }
 0x39e   :  { %v1390_v40 = vsub.f32 %v1326_v27, %v1358_v58  ;;  %v1513_v50 = vmul.f32 %v3046_v8, %v1417_v11 }
 0x39f   :  { %v1389_v56 = vsub.f32 %v1325_v7, %v1357_v53  ;;  %v1550_v6 = vmul.f32 %v4098_v55, %v1514_v41 }
 0x3a0   :  { %v1454_v33 = vadd.f32 1e-05, %v1390_v40  ;;  %v1549_v49 = vmul.f32 %v4098_v55, %v1513_v50 }
 0x3a1   :  { %v1453_v25 = vadd.f32 1e-05, %v1389_v56  ;;  %v1586_v19 = vadd.f32 %v4114_v61, %v1550_v6 }
 0x3a2   :  { %3051 = vrsqrt.f32 %v1454_v33  ;;  %v1585_v9 = vadd.f32 %v4114_v61, %v1549_v49 }
 0x3a3   :  { %3053 = vrsqrt.f32 %v1453_v25 }
 0x3a4   :  { %v3048_v47 = vpop.eup %3047  ;;  %2582 = vmatprep.mubr.f32.mxu0 %v1585_v9 }
 0x3a5   :  { %v3050_v20 = vpop.eup %3049  ;;  %2583 = vmatmul.mubr.f32.gmra.mrb[58].mxu0 %v1586_v19  ;;  %v1516_v52 = vmul.f32 %v3048_v47, %v1420_v32 }
 0x3a6   :  { %v1515_v12 = vmul.f32 %v3050_v20, %v1419_v16 }
 0x3a7   :  { %v1552_v46 = vmul.f32 %v4098_v55, %v1516_v52 }
 0x3a8   :  { %v1551_v36 = vmul.f32 %v4098_v55, %v1515_v12 }
 0x3a9   :  { %v1588_v30 = vadd.f32 %v4114_v61, %v1552_v46 }
 0x3aa   :  { %v1587_v51 = vadd.f32 %v4114_v61, %v1551_v36 }
 0x3ac   :  { %v3052_v26 = vpop.eup %3051  ;;  %2585 = vmatprep.mubr.f32.mxu0 %v1587_v51 }
 0x3ad   :  { %v3054_v37 = vpop.eup %3053  ;;  %2586 = vmatmul.mubr.f32.gmra.mrb[60].mxu0 %v1588_v30  ;;  %v1518_v15 = vmul.f32 %v3052_v26, %v1422_v21 }
 0x3ae   :  { %v1517_v4 = vmul.f32 %v3054_v37, %v1421_v57 }
 0x3af   :  { %v1554_v34 = vmul.f32 %v4098_v55, %v1518_v15 }
 0x3b0   :  { %v1553_v24 = vmul.f32 %v4098_v55, %v1517_v4 }
 0x3b1   :  { %v1590_v31 = vadd.f32 %v4114_v61, %v1554_v34 }
 0x3b2   :  { %v1589_v60 = vadd.f32 %v4114_v61, %v1553_v24 }
 0x3b4   :  { %2588 = vmatprep.mubr.f32.mxu0 %v1589_v60 }
 0x3b5   :  { %2589 = vmatmul.mubr.f32.gmra.mrb[62].mxu0 %v1590_v31 }
 0x410   :  { %v2545_v0 = vpop.f32.mrb[32].mxu0 }
 0x411   :  { %v1684_v1 = vadd.f32 %v2545_v0, %v4376_v2  ;;  %v1678_v10 = vpop.f32.mrb[33].mxu0 }
 0x412   :  { %v1679_v28 = vadd.f32 %v4376_v2, %v1678_v10 }
 0x414   :  { %3055 = vtanh.f32 %v1679_v28 }
 0x415   :  { %3057 = vtanh.f32 %v1684_v1 }
 0x418   :  { %v2548_v55 = vpop.f32.mrb[34].mxu0 }
 0x419   :  { %v1694_v62 = vadd.f32 %v2548_v55, %v4376_v2  ;;  %v1688_v42 = vpop.f32.mrb[35].mxu0 }
 0x41a   :  { %v1689_v61 = vadd.f32 %v4376_v2, %v1688_v42 }
 0x41c   :  { %3059 = vtanh.f32 %v1689_v61 }
 0x41d   :  { %3061 = vtanh.f32 %v1694_v62 }
 0x41e   :  { %v3056_v5 = vpop.eup %3055 }
 0x41f   :  { %v3058_v44 = vpop.eup %3057  ;;  %2623 = vmatprep.mubr.f32.mxu1 %v3056_v5 }
 0x420   :  { %v2551_v29 = vpop.f32.mrb[36].mxu0  ;;  %2624 = vmatmul.mubr.f32.vlgmr.msra.gmra.mrb[32].mxu1 %v3058_v44 }
 0x421   :  { %v1704_v22 = vadd.f32 %v2551_v29, %v4376_v2  ;;  %v1698_v54 = vpop.f32.mrb[37].mxu0 }
 0x422   :  { %v1699_v13 = vadd.f32 %v4376_v2, %v1698_v54 }
 0x424   :  { %3063 = vtanh.f32 %v1699_v13 }
 0x425   :  { %3065 = vtanh.f32 %v1704_v22 }
 0x426   :  { %v3060_v38 = vpop.eup %3059 }
 0x427   :  { %v3062_v35 = vpop.eup %3061  ;;  %2626 = vmatprep.mubr.f32.mxu1 %v3060_v38 }
 0x428   :  { %v2554_v18 = vpop.f32.mrb[38].mxu0  ;;  %2627 = vmatmul.mubr.f32.gmra.mrb[34].mxu1 %v3062_v35 }
 0x429   :  { %v1714_v59 = vadd.f32 %v2554_v18, %v4376_v2  ;;  %v1708_v23 = vpop.f32.mrb[39].mxu0 }
 0x42a   :  { %v1709_v45 = vadd.f32 %v4376_v2, %v1708_v23 }
 0x42c   :  { %3067 = vtanh.f32 %v1709_v45 }
 0x42d   :  { %3069 = vtanh.f32 %v1714_v59 }
 0x42e   :  { %v3064_v39 = vpop.eup %3063 }
 0x42f   :  { %v3066_v43 = vpop.eup %3065  ;;  %2629 = vmatprep.mubr.f32.mxu1 %v3064_v39 }
 0x430   :  { %v2557_v14 = vpop.f32.mrb[40].mxu0  ;;  %2630 = vmatmul.mubr.f32.gmra.mrb[36].mxu1 %v3066_v43 }
 0x431   :  { %v1724_v3 = vadd.f32 %v2557_v14, %v4376_v2  ;;  %v1718_v48 = vpop.f32.mrb[41].mxu0 }
 0x432   :  { %v1719_v63 = vadd.f32 %v4376_v2, %v1718_v48 }
 0x434   :  { %3071 = vtanh.f32 %v1719_v63 }
 0x435   :  { %3073 = vtanh.f32 %v1724_v3 }
 0x436   :  { %v3068_v11 = vpop.eup %3067 }
 0x437   :  { %v3070_v58 = vpop.eup %3069  ;;  %2632 = vmatprep.mubr.f32.mxu1 %v3068_v11 }
 0x438   :  { %v2560_v27 = vpop.f32.mrb[42].mxu0  ;;  %2633 = vmatmul.mubr.f32.gmra.mrb[38].mxu1 %v3070_v58 }
 0x439   :  { %v1734_v17 = vadd.f32 %v2560_v27, %v4376_v2  ;;  %v1728_v8 = vpop.f32.mrb[43].mxu0 }
 0x43a   :  { %v1729_v53 = vadd.f32 %v4376_v2, %v1728_v8 }
 0x43c   :  { %3075 = vtanh.f32 %v1729_v53 }
 0x43d   :  { %3077 = vtanh.f32 %v1734_v17 }
 0x43e   :  { %v3072_v7 = vpop.eup %3071 }
 0x43f   :  { %v3074_v41 = vpop.eup %3073  ;;  %2635 = vmatprep.mubr.f32.mxu1 %v3072_v7 }
 0x440   :  { %v2563_v40 = vpop.f32.mrb[44].mxu0  ;;  %2636 = vmatmul.mubr.f32.gmra.mrb[40].mxu1 %v3074_v41  ;;  %v4413_v41 = vld [vmem:[%s4545_s1 + $0x7] ss:$0 sm:$0xff] }
 0x441   :  { %v1744_v50 = vadd.f32 %v2563_v40, %v4376_v2  ;;  %v1738_v56 = vpop.f32.mrb[45].mxu0 }
 0x442   :  { %v1739_v6 = vadd.f32 %v4376_v2, %v1738_v56 }
 0x444   :  { %3079 = vtanh.f32 %v1739_v6 }
 0x445   :  { %3081 = vtanh.f32 %v1744_v50 }
 0x446   :  { %v3076_v33 = vpop.eup %3075 }
 0x447   :  { %v3078_v49 = vpop.eup %3077  ;;  %2638 = vmatprep.mubr.f32.mxu1 %v3076_v33 }
 0x448   :  { %v2566_v25 = vpop.f32.mrb[46].mxu0  ;;  %2639 = vmatmul.mubr.f32.gmra.mrb[42].mxu1 %v3078_v49 }
 0x449   :  { %v1754_v9 = vadd.f32 %v2566_v25, %v4376_v2  ;;  %v1748_v32 = vpop.f32.mrb[47].mxu0 }
 0x44a   :  { %v1749_v19 = vadd.f32 %v4376_v2, %v1748_v32 }
 0x44c   :  { %3083 = vtanh.f32 %v1749_v19 }
 0x44d   :  { %3085 = vtanh.f32 %v1754_v9 }
 0x44e   :  { %v3080_v47 = vpop.eup %3079 }
 0x44f   :  { %v3082_v16 = vpop.eup %3081  ;;  %2641 = vmatprep.mubr.f32.mxu1 %v3080_v47 }
 0x450   :  { %v2569_v20 = vpop.f32.mrb[48].mxu0  ;;  %2642 = vmatmul.mubr.f32.gmra.mrb[44].mxu1 %v3082_v16 }
 0x451   :  { %v1764_v52 = vadd.f32 %v2569_v20, %v4376_v2  ;;  %v1758_v12 = vpop.f32.mrb[49].mxu0 }
 0x452   :  { %v1759_v46 = vadd.f32 %v4376_v2, %v1758_v12 }
 0x454   :  { %3087 = vtanh.f32 %v1759_v46 }
 0x455   :  { %3089 = vtanh.f32 %v1764_v52 }
 0x456   :  { %v3084_v36 = vpop.eup %3083 }
 0x457   :  { %v3086_v51 = vpop.eup %3085  ;;  %2644 = vmatprep.mubr.f32.mxu1 %v3084_v36 }
 0x458   :  { %v2572_v21 = vpop.f32.mrb[50].mxu0  ;;  %2645 = vmatmul.mubr.f32.gmra.mrb[46].mxu1 %v3086_v51 }
 0x459   :  { %v1774_v30 = vadd.f32 %v2572_v21, %v4376_v2  ;;  %v1768_v26 = vpop.f32.mrb[51].mxu0 }
 0x45a   :  { %v1769_v57 = vadd.f32 %v4376_v2, %v1768_v26 }
 0x45c   :  { %3091 = vtanh.f32 %v1769_v57 }
 0x45d   :  { %3093 = vtanh.f32 %v1774_v30 }
 0x45e   :  { %v3088_v37 = vpop.eup %3087 }
 0x45f   :  { %v3090_v15 = vpop.eup %3089  ;;  %2647 = vmatprep.mubr.f32.mxu1 %v3088_v37 }
 0x460   :  { %v2575_v4 = vpop.f32.mrb[52].mxu0  ;;  %2648 = vmatmul.mubr.f32.gmra.mrb[48].mxu1 %v3090_v15 }
 0x461   :  { %v1784_v34 = vadd.f32 %v2575_v4, %v4376_v2  ;;  %v1778_v24 = vpop.f32.mrb[53].mxu0 }
 0x462   :  { %v1779_v60 = vadd.f32 %v4376_v2, %v1778_v24 }
 0x464   :  { %3095 = vtanh.f32 %v1779_v60 }
 0x465   :  { %3097 = vtanh.f32 %v1784_v34 }
 0x466   :  { %v3092_v31 = vpop.eup %3091 }
 0x467   :  { %v3094_v0 = vpop.eup %3093  ;;  %2650 = vmatprep.mubr.f32.mxu1 %v3092_v31 }
 0x468   :  { %v2578_v1 = vpop.f32.mrb[54].mxu0  ;;  %2651 = vmatmul.mubr.f32.gmra.mrb[50].mxu1 %v3094_v0 }
 0x469   :  { %v1794_v10 = vadd.f32 %v2578_v1, %v4376_v2  ;;  %v1788_v28 = vpop.f32.mrb[55].mxu0 }
 0x46a   :  { %v1789_v55 = vadd.f32 %v4376_v2, %v1788_v28 }
 0x46c   :  { %3099 = vtanh.f32 %v1789_v55 }
 0x46d   :  { %3101 = vtanh.f32 %v1794_v10 }
 0x46e   :  { %v3096_v62 = vpop.eup %3095 }
 0x46f   :  { %v3098_v42 = vpop.eup %3097  ;;  %2653 = vmatprep.mubr.f32.mxu1 %v3096_v62 }
 0x470   :  { %v2581_v61 = vpop.f32.mrb[56].mxu0  ;;  %2654 = vmatmul.mubr.f32.gmra.mrb[52].mxu1 %v3098_v42 }
 0x471   :  { %v1804_v5 = vadd.f32 %v2581_v61, %v4376_v2  ;;  %v1798_v44 = vpop.f32.mrb[57].mxu0 }
 0x472   :  { %v1799_v29 = vadd.f32 %v4376_v2, %v1798_v44 }
 0x474   :  { %3103 = vtanh.f32 %v1799_v29 }
 0x475   :  { %3105 = vtanh.f32 %v1804_v5 }
 0x476   :  { %v3100_v22 = vpop.eup %3099 }
 0x477   :  { %v3102_v54 = vpop.eup %3101  ;;  %2656 = vmatprep.mubr.f32.mxu1 %v3100_v22 }
 0x478   :  { %v2584_v13 = vpop.f32.mrb[58].mxu0  ;;  %2657 = vmatmul.mubr.f32.gmra.mrb[54].mxu1 %v3102_v54 }
 0x479   :  { %v1814_v38 = vadd.f32 %v2584_v13, %v4376_v2  ;;  %v1808_v35 = vpop.f32.mrb[59].mxu0 }
 0x47a   :  { %v1809_v18 = vadd.f32 %v4376_v2, %v1808_v35 }
 0x47c   :  { %3107 = vtanh.f32 %v1809_v18 }
 0x47d   :  { %3109 = vtanh.f32 %v1814_v38 }
 0x47e   :  { %v3104_v59 = vpop.eup %3103 }
 0x47f   :  { %v3106_v23 = vpop.eup %3105  ;;  %2659 = vmatprep.mubr.f32.mxu1 %v3104_v59 }
 0x480   :  { %v2587_v45 = vpop.f32.mrb[60].mxu0  ;;  %2660 = vmatmul.mubr.f32.gmra.mrb[56].mxu1 %v3106_v23 }
 0x481   :  { %v1824_v39 = vadd.f32 %v2587_v45, %v4376_v2  ;;  %v1818_v43 = vpop.f32.mrb[61].mxu0 }
 0x482   :  { %v1819_v14 = vadd.f32 %v4376_v2, %v1818_v43 }
 0x484   :  { %3111 = vtanh.f32 %v1819_v14 }
 0x485   :  { %3113 = vtanh.f32 %v1824_v39 }
 0x486   :  { %v3108_v3 = vpop.eup %3107 }
 0x487   :  { %v3110_v48 = vpop.eup %3109  ;;  %2662 = vmatprep.mubr.f32.mxu1 %v3108_v3 }
 0x488   :  { %v2590_v63 = vpop.f32.mrb[62].mxu0  ;;  %2663 = vmatmul.mubr.f32.gmra.mrb[58].mxu1 %v3110_v48 }
 0x489   :  { %v1834_v11 = vadd.f32 %v2590_v63, %v4376_v2  ;;  %v1828_v58 = vpop.f32.mrb[63].mxu0 }
 0x48a   :  { %v1829_v27 = vadd.f32 %v4376_v2, %v1828_v58 }
 0x48c   :  { %3115 = vtanh.f32 %v1829_v27 }
 0x48d   :  { %3117 = vtanh.f32 %v1834_v11 }
 0x48e   :  { %v3112_v17 = vpop.eup %3111 }
 0x48f   :  { %v3114_v8 = vpop.eup %3113  ;;  %2665 = vmatprep.mubr.f32.mxu1 %v3112_v17 }
 0x490   :  { %2666 = vmatmul.mubr.f32.gmra.mrb[60].mxu1 %v3114_v8 }
 0x496   :  { %v3116_v53 = vpop.eup %3115 }
 0x497   :  { %v3118_v7 = vpop.eup %3117  ;;  %2668 = vmatprep.mubr.f32.mxu1 %v3116_v53 }
 0x498   :  { %2669 = vmatmul.mubr.f32.gmra.mrb[62].mxu1 %v3118_v7 }
 0x4f3   :  { %v2625_v40 = vpop.f32.mrb[32].mxu1 }
 0x4f4   :  { %v1962_v50 = vadd.f32 %v2625_v40, %v4413_v41  ;;  %v1956_v56 = vpop.f32.mrb[33].mxu1 }
 0x4f5   :  { %v1957_v2 = vadd.f32 %v4413_v41, %v1956_v56 }
 0x4f6   :  { %2116 = vst [vmem:[%s4549_s6 + $0x8] sm:$0xff] %v1962_v50 }
 0x4f7   :  { %2115 = vst [vmem:[%s4549_s6] sm:$0xff] %v1957_v2 }
 0x4fb   :  { %v2628_v6 = vpop.f32.mrb[34].mxu1 }
 0x4fc   :  { %v1972_v33 = vadd.f32 %v2628_v6, %v4413_v41  ;;  %v1966_v49 = vpop.f32.mrb[35].mxu1 }
 0x4fd   :  { %v1967_v25 = vadd.f32 %v4413_v41, %v1966_v49 }
 0x4fe   :  { %2118 = vst [vmem:[%s4549_s6 + $0x18] sm:$0xff] %v1972_v33 }
 0x4ff   :  { %2117 = vst [vmem:[%s4549_s6 + $0x10] sm:$0xff] %v1967_v25 }
 0x503   :  { %v2631_v9 = vpop.f32.mrb[36].mxu1 }
 0x504   :  { %v1982_v32 = vadd.f32 %v2631_v9, %v4413_v41  ;;  %v1976_v19 = vpop.f32.mrb[37].mxu1 }
 0x505   :  { %v1977_v47 = vadd.f32 %v4413_v41, %v1976_v19 }
 0x506   :  { %2120 = vst [vmem:[%s4549_s6 + $0x28] sm:$0xff] %v1982_v32 }
 0x507   :  { %2119 = vst [vmem:[%s4549_s6 + $0x20] sm:$0xff] %v1977_v47 }
 0x50b   :  { %v2634_v16 = vpop.f32.mrb[38].mxu1 }
 0x50c   :  { %v1992_v20 = vadd.f32 %v2634_v16, %v4413_v41  ;;  %v1986_v52 = vpop.f32.mrb[39].mxu1 }
 0x50d   :  { %v1987_v12 = vadd.f32 %v4413_v41, %v1986_v52 }
 0x50e   :  { %2122 = vst [vmem:[%s4549_s6 + $0x38] sm:$0xff] %v1992_v20 }
 0x50f   :  { %2121 = vst [vmem:[%s4549_s6 + $0x30] sm:$0xff] %v1987_v12 }
 0x513   :  { %v2637_v46 = vpop.f32.mrb[40].mxu1 }
 0x514   :  { %v2002_v36 = vadd.f32 %v2637_v46, %v4413_v41  ;;  %v1996_v51 = vpop.f32.mrb[41].mxu1 }
 0x515   :  { %v1997_v21 = vadd.f32 %v4413_v41, %v1996_v51 }
 0x516   :  { %2124 = vst [vmem:[%s4549_s6 + $0x48] sm:$0xff] %v2002_v36 }
 0x517   :  { %2123 = vst [vmem:[%s4549_s6 + $0x40] sm:$0xff] %v1997_v21 }
 0x51b   :  { %v2640_v30 = vpop.f32.mrb[42].mxu1 }
 0x51c   :  { %v2012_v26 = vadd.f32 %v2640_v30, %v4413_v41  ;;  %v2006_v57 = vpop.f32.mrb[43].mxu1 }
 0x51d   :  { %v2007_v37 = vadd.f32 %v4413_v41, %v2006_v57 }
 0x51e   :  { %2126 = vst [vmem:[%s4549_s6 + $0x58] sm:$0xff] %v2012_v26 }
 0x51f   :  { %2125 = vst [vmem:[%s4549_s6 + $0x50] sm:$0xff] %v2007_v37 }
 0x523   :  { %v2643_v15 = vpop.f32.mrb[44].mxu1 }
 0x524   :  { %v2022_v4 = vadd.f32 %v2643_v15, %v4413_v41  ;;  %v2016_v34 = vpop.f32.mrb[45].mxu1 }
 0x525   :  { %v2017_v24 = vadd.f32 %v4413_v41, %v2016_v34 }
 0x526   :  { %2128 = vst [vmem:[%s4549_s6 + $0x68] sm:$0xff] %v2022_v4 }
 0x527   :  { %2127 = vst [vmem:[%s4549_s6 + $0x60] sm:$0xff] %v2017_v24 }
 0x52b   :  { %v2646_v60 = vpop.f32.mrb[46].mxu1 }
 0x52c   :  { %v2032_v31 = vadd.f32 %v2646_v60, %v4413_v41  ;;  %v2026_v0 = vpop.f32.mrb[47].mxu1 }
 0x52d   :  { %v2027_v1 = vadd.f32 %v4413_v41, %v2026_v0 }
 0x52e   :  { %2130 = vst [vmem:[%s4549_s6 + $0x78] sm:$0xff] %v2032_v31 }
 0x52f   :  { %2129 = vst [vmem:[%s4549_s6 + $0x70] sm:$0xff] %v2027_v1 }
 0x533   :  { %v2649_v10 = vpop.f32.mrb[48].mxu1 }
 0x534   :  { %v2042_v28 = vadd.f32 %v2649_v10, %v4413_v41  ;;  %v2036_v55 = vpop.f32.mrb[49].mxu1 }
 0x535   :  { %v2037_v62 = vadd.f32 %v4413_v41, %v2036_v55 }
 0x536   :  { %2132 = vst [vmem:[%s4549_s6 + $0x88] sm:$0xff] %v2042_v28 }
 0x537   :  { %2131 = vst [vmem:[%s4549_s6 + $0x80] sm:$0xff] %v2037_v62 }
 0x53b   :  { %v2652_v42 = vpop.f32.mrb[50].mxu1 }
 0x53c   :  { %v2052_v61 = vadd.f32 %v2652_v42, %v4413_v41  ;;  %v2046_v5 = vpop.f32.mrb[51].mxu1 }
 0x53d   :  { %v2047_v44 = vadd.f32 %v4413_v41, %v2046_v5 }
 0x53e   :  { %2134 = vst [vmem:[%s4549_s6 + $0x98] sm:$0xff] %v2052_v61 }
 0x53f   :  { %2133 = vst [vmem:[%s4549_s6 + $0x90] sm:$0xff] %v2047_v44 }
 0x543   :  { %v2655_v29 = vpop.f32.mrb[52].mxu1 }
 0x544   :  { %v2062_v22 = vadd.f32 %v2655_v29, %v4413_v41  ;;  %v2056_v54 = vpop.f32.mrb[53].mxu1 }
 0x545   :  { %v2057_v13 = vadd.f32 %v4413_v41, %v2056_v54 }
 0x546   :  { %2136 = vst [vmem:[%s4549_s6 + $0xa8] sm:$0xff] %v2062_v22 }
 0x547   :  { %2135 = vst [vmem:[%s4549_s6 + $0xa0] sm:$0xff] %v2057_v13 }
 0x54b   :  { %v2658_v38 = vpop.f32.mrb[54].mxu1 }
 0x54c   :  { %v2072_v35 = vadd.f32 %v2658_v38, %v4413_v41  ;;  %v2066_v18 = vpop.f32.mrb[55].mxu1 }
 0x54d   :  { %v2067_v59 = vadd.f32 %v4413_v41, %v2066_v18 }
 0x54e   :  { %2138 = vst [vmem:[%s4549_s6 + $0xb8] sm:$0xff] %v2072_v35 }
 0x54f   :  { %2137 = vst [vmem:[%s4549_s6 + $0xb0] sm:$0xff] %v2067_v59 }
 0x553   :  { %v2661_v23 = vpop.f32.mrb[56].mxu1 }
 0x554   :  { %v2082_v45 = vadd.f32 %v2661_v23, %v4413_v41  ;;  %v2076_v39 = vpop.f32.mrb[57].mxu1 }
 0x555   :  { %v2077_v43 = vadd.f32 %v4413_v41, %v2076_v39 }
 0x556   :  { %2140 = vst [vmem:[%s4549_s6 + $0xc8] sm:$0xff] %v2082_v45 }
 0x557   :  { %2139 = vst [vmem:[%s4549_s6 + $0xc0] sm:$0xff] %v2077_v43 }
 0x55b   :  { %v2664_v14 = vpop.f32.mrb[58].mxu1 }
 0x55c   :  { %v2092_v3 = vadd.f32 %v2664_v14, %v4413_v41  ;;  %v2086_v48 = vpop.f32.mrb[59].mxu1 }
 0x55d   :  { %v2087_v63 = vadd.f32 %v4413_v41, %v2086_v48 }
 0x55e   :  { %2142 = vst [vmem:[%s4549_s6 + $0xd8] sm:$0xff] %v2092_v3 }
 0x55f   :  { %2141 = vst [vmem:[%s4549_s6 + $0xd0] sm:$0xff] %v2087_v63 }
 0x563   :  { %v2667_v11 = vpop.f32.mrb[60].mxu1 }
 0x564   :  { %v2102_v58 = vadd.f32 %v2667_v11, %v4413_v41  ;;  %v2096_v27 = vpop.f32.mrb[61].mxu1 }
 0x565   :  { %v2097_v17 = vadd.f32 %v4413_v41, %v2096_v27 }
 0x566   :  { %2144 = vst [vmem:[%s4549_s6 + $0xe8] sm:$0xff] %v2102_v58 }
 0x567   :  { %2143 = vst [vmem:[%s4549_s6 + $0xe0] sm:$0xff] %v2097_v17 }
 0x56b   :  { %v2670_v8 = vpop.f32.mrb[62].mxu1 }
 0x56c   :  { %v2112_v53 = vadd.f32 %v2670_v8, %v4413_v41  ;;  %v2106_v7 = vpop.f32.mrb[63].mxu1 }
 0x56d   :  { %v2107_v40 = vadd.f32 %v4413_v41, %v2106_v7 }
 0x56e   :  { %2146 = vst [vmem:[%s4549_s6 + $0xf8] sm:$0xff] %v2112_v53 }
 0x56f   :  { %2145 = vst [vmem:[%s4549_s6 + $0xf0] sm:$0xff] %v2107_v40 }

</bundles_post_ra>
